<compile_context>
chip_gen: v6e
topology: v6e:2x2x1
jax: 0.10.0
libtpu: 0.0.40
codegen_flags: <defaults>
</compile_context>

<pallas_src>
import functools

import jax
import jax.numpy as jnp
from jax import lax
from jax.experimental import pallas as pl
from jax.experimental.pallas import tpu as pltpu


# --------------------------- per-generation configuration ---------------------------

def _tpu_config():
    try:
        cap = int(pltpu.get_tpu_info().vmem_capacity_bytes)
    except Exception:
        cap = 64 * 1024 * 1024              # conservative (v7x-sized) fallback
    big = cap >= 100 * 1024 * 1024          # v5e / v6e: 128 MiB; v7x: 64 MiB
    return {
        "vmem_limit": min(int(cap * 0.75), 110 * 1024 * 1024),
        "lin_tm": 1024 if big else 512,
        "lin_tn": 512 if big else 256,
        "ln_tm": 2048 if big else 1024,
        "attn_group": 64 if big else 32,
    }


_CFG = _tpu_config()


# ------------------------------- tile-size helpers ----------------------------------

def _pick_tile_sub(n, target):
    """Row (sublane) tile: multiple of 8 dividing n, else n itself."""
    if n <= target:
        return n
    t = (target // 8) * 8
    while t >= 8:
        if n % t == 0:
            return t
        t -= 8
    return n


def _pick_tile_lane(n, target):
    """Lane tile: multiple of 128 dividing n, else n itself."""
    if n <= target:
        return n
    t = (target // 128) * 128
    while t >= 128:
        if n % t == 0:
            return t
        t -= 128
    return n


def _pick_group(nch, c, d, cfg):
    """LSH buckets per attention grid step (must divide nch), bounded by VMEM footprint."""
    # per-group-element footprint estimate: double-buffered bf16 qk/v blocks,
    # double-buffered bf16 o block, f32 dots/e intermediates (cur + back).
    per = 2 * 2 * (c * d * 2) + 2 * (c * d * 2) + 4 * (c * c * 4)
    budget = cfg["vmem_limit"] // 4
    target = max(1, min(cfg["attn_group"], budget // max(per, 1)))
    g = min(target, nch)
    while nch % g != 0:
        g -= 1
    return max(g, 1)


# --------------------------------- Pallas kernels ------------------------------------

def _linear_kernel(x_ref, w_ref, b_ref, o_ref, *, activation):
    acc = jnp.dot(x_ref[...], w_ref[...], preferred_element_type=jnp.float32)
    acc = acc + b_ref[...]
    if activation == "gelu":
        # exact-erf GELU fused in the epilogue (EUP slot, ~free while the MXU runs)
        acc = 0.5 * acc * (1.0 + lax.erf(acc * 0.7071067811865476))
    o_ref[...] = acc.astype(o_ref.dtype)


def linear(x2d, w, b, out_dtype=jnp.float32, activation=None):
    """x2d: (M, K); w: (K, N); b: (N,).  bf16 operands, f32 MXU accumulation."""
    M, K = x2d.shape
    _, N = w.shape
    tm = _pick_tile_sub(M, _CFG["lin_tm"])
    tn = _pick_tile_lane(N, _CFG["lin_tn"])
    # TODO(synk): add a K grid axis + f32 VMEM accumulator (pl.when init/finalize)
    # once K = 4*emb grows beyond ~2048; the whole K panel is streamed for now.
    return pl.pallas_call(
        functools.partial(_linear_kernel, activation=activation),
        out_shape=jax.ShapeDtypeStruct((M, N), out_dtype),
        grid=(M // tm, N // tn),
        in_specs=[pl.BlockSpec((tm, K), lambda i, j: (i, 0)),
                  pl.BlockSpec((K, tn), lambda i, j: (0, j)),
                  pl.BlockSpec((1, tn), lambda i, j: (0, j))],
        out_specs=pl.BlockSpec((tm, tn), lambda i, j: (i, j)),
        compiler_params=pltpu.CompilerParams(
            dimension_semantics=("parallel", "parallel"),
            vmem_limit_bytes=_CFG["vmem_limit"]),
    )(x2d.astype(jnp.bfloat16), w.astype(jnp.bfloat16),
      b.astype(jnp.float32).reshape(1, N))


def _layernorm_kernel(x_ref, w_ref, b_ref, o_ref, *, eps):
    x = x_ref[...].astype(jnp.float32)
    mu = jnp.mean(x, axis=-1, keepdims=True)
    xc = x - mu
    var = jnp.mean(xc * xc, axis=-1, keepdims=True)
    inv = lax.rsqrt(var + eps)
    o_ref[...] = (xc * inv * w_ref[...] + b_ref[...]).astype(o_ref.dtype)


def layer_norm(x2d, w, b, eps=1e-5, out_dtype=jnp.bfloat16):
    """Mem-bound; emits bf16 directly since all consumers are bf16 matmuls."""
    M, E = x2d.shape
    tm = _pick_tile_sub(M, _CFG["ln_tm"])
    return pl.pallas_call(
        functools.partial(_layernorm_kernel, eps=eps),
        out_shape=jax.ShapeDtypeStruct((M, E), out_dtype),
        grid=(M // tm,),
        in_specs=[pl.BlockSpec((tm, E), lambda i: (i, 0)),
                  pl.BlockSpec((1, E), lambda i: (0, 0)),
                  pl.BlockSpec((1, E), lambda i: (0, 0))],
        out_specs=pl.BlockSpec((tm, E), lambda i: (i, 0)),
        compiler_params=pltpu.CompilerParams(
            dimension_semantics=("parallel",),
            vmem_limit_bytes=_CFG["vmem_limit"]),
    )(x2d, w.reshape(1, E), b.reshape(1, E))


def _lsh_bucket_attn_kernel(qk_ref, qkp_ref, v_ref, vp_ref, pos_ref, posp_ref,
                            o_ref, lse_ref):
    qk_cur = qk_ref[...][0]               # (G, c, d)  bf16 (unnormalized qk)
    qk_prev = qkp_ref[...][0, 0]          # (c, d)     chunk preceding the group
    v_cur = v_ref[...][0]                 # (G, c, d)  bf16
    v_prev = vp_ref[...][0, 0]            # (c, d)
    pos_cur = pos_ref[...][0, :, :, 0]    # (G, c)     int32 original positions
    pos_prev = posp_ref[...][0, 0, :, 0]  # (c,)

    G, c, d = qk_cur.shape

    # look_one_back built in VMEM, kept in bf16 (no f32 window materialization): the
    # "one-back" chunk of group element i is chunk i-1 (prev-group's last chunk for i==0).
    if G > 1:
        qk_back = jnp.concatenate([qk_prev[None], qk_cur[:-1]], axis=0)      # (G, c, d)
        v_back = jnp.concatenate([v_prev[None], v_cur[:-1]], axis=0)         # (G, c, d)
        pos_back = jnp.concatenate([pos_prev[None], pos_cur[:-1]], axis=0)   # (G, c)
    else:
        qk_back = qk_prev[None]
        v_back = v_prev[None]
        pos_back = pos_prev[None]

    # make_unit_length fused as a per-key column scale of the dots; the d**-0.5 query
    # scale is folded into the same factor.  Norms computed in f32 over the current
    # chunks only (the back norms are the shifted current norms + the prev chunk's).
    scale = d ** (-0.5)
    ssq_cur = jnp.sum(jnp.square(qk_cur.astype(jnp.float32)), axis=-1)       # (G, c)
    ssq_prev = jnp.sum(jnp.square(qk_prev.astype(jnp.float32)), axis=-1)     # (c,)
    if G > 1:
        ssq_back = jnp.concatenate([ssq_prev[None], ssq_cur[:-1]], axis=0)   # (G, c)
    else:
        ssq_back = ssq_prev[None]
    col_cur = scale / (jnp.sqrt(ssq_cur) + 1e-6)       # == scale / (|k| + eps)
    col_back = scale / (jnp.sqrt(ssq_back) + 1e-6)

    # two MXU matmuls (current window + one-back window) instead of a 2c concat
    dots_cur = jnp.einsum('gcd,gkd->gck', qk_cur, qk_cur,
                          preferred_element_type=jnp.float32) * col_cur[:, None, :]
    dots_back = jnp.einsum('gcd,gkd->gck', qk_cur, qk_back,
                           preferred_element_type=jnp.float32) * col_back[:, None, :]

    # self-attention mask (matches masked_fill_(-100000.0) in the reference)
    dots_cur = jnp.where(pos_cur[:, :, None] == pos_cur[:, None, :], -1e5, dots_cur)
    dots_back = jnp.where(pos_cur[:, :, None] == pos_back[:, None, :], -1e5, dots_back)
    # TODO(synk): causal / attend_across_buckets=False / allow_duplicate_attention=False
    # masking branches are not exercised by the default Reformer config.

    # single-pass softmax over the 2c window; EXACT normalization so probs stay
    # consistent with the lse used later by the cross-hash combination.
    m = jnp.maximum(jnp.max(dots_cur, axis=-1, keepdims=True),
                    jnp.max(dots_back, axis=-1, keepdims=True))
    e_cur = jnp.exp(dots_cur - m)
    e_back = jnp.exp(dots_back - m)
    s = jnp.sum(e_cur, axis=-1, keepdims=True) + jnp.sum(e_back, axis=-1, keepdims=True)
    lse = m + jnp.log(s)                               # logsumexp(dots, -1, keepdim)
    inv_s = 1.0 / s

    o = jnp.einsum('gck,gkd->gcd', (e_cur * inv_s).astype(jnp.bfloat16), v_cur,
                   preferred_element_type=jnp.float32)
    o = o + jnp.einsum('gck,gkd->gcd', (e_back * inv_s).astype(jnp.bfloat16), v_back,
                       preferred_element_type=jnp.float32)
    o_ref[...] = o[None].astype(o_ref.dtype)           # bf16 out (halves unsort traffic)
    lse_ref[...] = lse[..., 0][None, None]              # (1, 1, G, c) store


def lsh_bucket_attention(bqk, bv, bpos):
    """bqk, bv: (bh, nch, c, d) bf16; bpos: (bh, nch, c, 1) int32."""
    bh, nch, c, d = bqk.shape
    G = _pick_group(nch, c, d, _CFG)    # buckets per grid step (amortizes step overhead)
    ng = nch // G

    cur4 = lambda b, g: (b, g, 0, 0)
    prev4 = lambda b, g: (b, (g * G + nch - 1) % nch, 0, 0)  # chunk just before the group

    o, lse = pl.pallas_call(
        _lsh_bucket_attn_kernel,
        out_shape=(jax.ShapeDtypeStruct((bh, nch, c, d), jnp.bfloat16),
                   jax.ShapeDtypeStruct((bh, ng, G, c), jnp.float32)),
        grid=(bh, ng),
        in_specs=[pl.BlockSpec((1, G, c, d), cur4),
                  pl.BlockSpec((1, 1, c, d), prev4),
                  pl.BlockSpec((1, G, c, d), cur4),
                  pl.BlockSpec((1, 1, c, d), prev4),
                  pl.BlockSpec((1, G, c, 1), cur4),
                  pl.BlockSpec((1, 1, c, 1), prev4)],
        out_specs=(pl.BlockSpec((1, G, c, d), cur4),
                   pl.BlockSpec((1, 1, G, c), lambda b, g: (b, g, 0, 0))),
        compiler_params=pltpu.CompilerParams(
            dimension_semantics=("parallel", "parallel"),
            vmem_limit_bytes=_CFG["vmem_limit"]),
    )(bqk, bqk, bv, bv, bpos, bpos)
    return o, lse.reshape(bh, nch, c)


# ----------------------------------- model glue --------------------------------------

def lsh_attention(qk, v, rot, bucket_size, n_hashes):
    """qk, v: (b, h, t, d_head) bf16; rot: (h, d_head, n_hashes, n_buckets//2) f32."""
    b, h, t, d = qk.shape
    bh = b * h
    n_buckets = t // bucket_size

    # --- hash_vectors (rotations broadcast over batch; per-head deterministic draw
    #     standing in for torch.randn inside each per-chunk lsh_attn call) ---
    rotated = jnp.einsum('bhtf,hfni->bhnti', qk.astype(jnp.float32), rot)
    rotated = jnp.concatenate([rotated, -rotated], axis=-1)
    buckets = jnp.argmax(rotated, axis=-1)                       # (b, h, n_hashes, t)
    offsets = (jnp.arange(n_hashes) * n_buckets).reshape(1, 1, -1, 1)
    buckets = (buckets + offsets).reshape(bh, n_hashes * t)

    # --- sort by (bucket, position) ---
    ticker = jnp.arange(n_hashes * t)[None, :]
    buckets_and_t = t * buckets + (ticker % t)
    sticker = jnp.argsort(buckets_and_t, axis=-1)
    undo_sort = jnp.argsort(sticker, axis=-1)
    st = (sticker % t).astype(jnp.int32)

    qk2 = qk.reshape(bh, t, d)
    v2 = v.reshape(bh, t, d)
    sqk = jnp.take_along_axis(qk2, st[:, :, None], axis=1)       # (bh, n_hashes*t, d) bf16
    sv = jnp.take_along_axis(v2, st[:, :, None], axis=1)
    # TODO(synk): fuse these gathers (and the unsort below) into the attention kernel via
    # scalar-prefetched row-gather DMAs to remove the extra HBM round trips.

    nch = n_hashes * n_buckets
    c = bucket_size
    o_c, lse_c = lsh_bucket_attention(
        sqk.reshape(bh, nch, c, d),
        sv.reshape(bh, nch, c, d),
        st.reshape(bh, nch, c, 1))

    so = o_c.reshape(bh, n_hashes * t, d)            # bf16
    slogits = lse_c.reshape(bh, n_hashes * t)        # f32

    # unsort (bf16 gather for o -> half the HBM traffic)
    o = jnp.take_along_axis(so, undo_sort[:, :, None], axis=1)
    logits = jnp.take_along_axis(slogits, undo_sort, axis=1)

    if n_hashes == 1:
        return o.astype(jnp.float32)
    o = o.reshape(bh, n_hashes, t, d)
    logits = logits.reshape(bh, n_hashes, t, 1)
    m = jnp.max(logits, axis=1, keepdims=True)
    lse_h = m + jnp.log(jnp.sum(jnp.exp(logits - m), axis=1, keepdims=True))
    probs = jnp.exp(logits - lse_h)
    return jnp.sum(o.astype(jnp.float32) * probs, axis=1)        # f32 accumulation


def lsh_self_attention(x, p, heads, bucket_size, n_hashes):
    b, t, e = x.shape
    dh = e // heads
    zero_bias = jnp.zeros((e,), jnp.float32)
    qk = linear(x.reshape(b * t, e), p['w_qk'], zero_bias,
                out_dtype=jnp.bfloat16).reshape(b, t, e)
    v = linear(x.reshape(b * t, e), p['w_v'], zero_bias,
               out_dtype=jnp.bfloat16).reshape(b, t, e)

    def merge_heads(z):
        return z.reshape(b, t, heads, dh).transpose(0, 2, 1, 3)  # (b, h, t, dh)

    attn_out = lsh_attention(merge_heads(qk), merge_heads(v),
                             p['rotations'], bucket_size, n_hashes)  # (b*h, t, dh) f32
    out = attn_out.reshape(b, heads, t, dh).transpose(0, 2, 1, 3).reshape(b, t, e)
    return linear(out.reshape(b * t, e), p['w_out'], p['b_out']).reshape(b, t, e)


def feed_forward(x, p):
    b, t, e = x.shape
    # bias + exact-erf GELU fused into the FF1 kernel epilogue; bf16 output feeds FF2.
    h = linear(x.reshape(b * t, e), p['w_ff1'], p['b_ff1'],
               out_dtype=jnp.bfloat16, activation="gelu")
    out = linear(h, p['w_ff2'], p['b_ff2'])
    return out.reshape(b, t, e)


def reversible_block(x, p, heads, bucket_size, n_hashes):
    # ReversibleBlock forward: y1 = x1 + f(x2); y2 = x2 + g(y1)
    x1, x2 = jnp.split(x, 2, axis=-1)
    b, t, e = x2.shape
    nx2 = layer_norm(x2.reshape(b * t, e), p['ln_f_w'], p['ln_f_b']).reshape(b, t, e)
    y1 = x1 + lsh_self_attention(nx2, p, heads, bucket_size, n_hashes)
    ny1 = layer_norm(y1.reshape(b * t, e), p['ln_g_w'], p['ln_g_b']).reshape(b, t, e)
    y2 = x2 + feed_forward(ny1, p)   # Chunk(ff_chunks) along seq is a no-op for per-token g
    return jnp.concatenate([y1, y2], axis=-1)


def reformer_forward(x, layers, heads, bucket_size, n_hashes):
    x = jnp.concatenate([x, x], axis=-1)
    for p in layers:
        x = reversible_block(x, p, heads, bucket_size, n_hashes)
    y1, y2 = jnp.split(x, 2, axis=-1)
    return y1 + y2


def init_reformer_params(key, emb, depth, heads, n_hashes, bucket_size, seq_len):
    d_head = emb // heads
    n_buckets = seq_len // bucket_size
    assert n_buckets % 2 == 0
    layers = []
    for _ in range(depth):
        key, *ks = jax.random.split(key, 7)
        layers.append(dict(
            ln_f_w=jnp.ones((emb,), jnp.float32),
            ln_f_b=jnp.zeros((emb,), jnp.float32),
            w_qk=(0.02 * jax.random.normal(ks[0], (emb, emb))).astype(jnp.bfloat16),
            w_v=(0.02 * jax.random.normal(ks[1], (emb, emb))).astype(jnp.bfloat16),
            w_out=(0.02 * jax.random.normal(ks[2], (emb, emb))).astype(jnp.bfloat16),
            b_out=jnp.zeros((emb,), jnp.float32),
            ln_g_w=jnp.ones((emb,), jnp.float32),
            ln_g_b=jnp.zeros((emb,), jnp.float32),
            w_ff1=(0.02 * jax.random.normal(ks[3], (emb, 4 * emb))).astype(jnp.bfloat16),
            b_ff1=jnp.zeros((4 * emb,), jnp.float32),
            w_ff2=(0.02 * jax.random.normal(ks[4], (4 * emb, emb))).astype(jnp.bfloat16),
            b_ff2=jnp.zeros((emb,), jnp.float32),
            # deterministic stand-in for torch.randn drawn inside each lsh_attn call
            rotations=jax.random.normal(
                ks[5], (heads, d_head, n_hashes, n_buckets // 2), jnp.float32),
        ))
    return layers


if __name__ == "__main__":
    emb, depth, heads = 32, 2, 4
    bucket_size, n_hashes = 4, 2
    b, t = 2, 16                       # t % bucket_size == 0, n_buckets = 4 (even)

    key = jax.random.PRNGKey(0)
    k_x, k_p = jax.random.split(key)
    x = jax.random.normal(k_x, (b, t, emb), jnp.float32)
    layers = init_reformer_params(k_p, emb, depth, heads, n_hashes, bucket_size, t)

    fwd = jax.jit(functools.partial(reformer_forward, heads=heads,
                                    bucket_size=bucket_size, n_hashes=n_hashes))
    out = fwd(x, layers)
    out = jax.block_until_ready(out)
    assert out.shape == (b, t, emb)
    assert bool(jnp.all(jnp.isfinite(out)))
    print("KERNEL_OK")
</pallas_src>

<mosaic_0001>
module attributes {stable_mosaic.version = 11 : i64} {
  func.func @_layernorm_kernel(%arg0: i32, %arg1: memref<32x32xf32, #tpu.memory_space<vmem>>, %arg2: memref<1x32xf32, #tpu.memory_space<vmem>>, %arg3: memref<1x32xf32, #tpu.memory_space<vmem>>, %arg4: memref<32x32xbf16, #tpu.memory_space<vmem>>) attributes {dimension_semantics = [#tpu.dimension_semantics<parallel>], iteration_bounds = array<i64: 1>, scalar_prefetch = 0 : i64, scratch_operands = 0 : i64, tpu.core_type = #tpu.core_type<tc>, window_params = [{transform_indices = @transform_0, window_bounds = array<i64: 32, 32>}, {pipeline_mode = #tpu.pipeline_mode<synchronous>, transform_indices = @transform_1, window_bounds = array<i64: 1, 32>}, {pipeline_mode = #tpu.pipeline_mode<synchronous>, transform_indices = @transform_2, window_bounds = array<i64: 1, 32>}, {transform_indices = @transform_3, window_bounds = array<i64: 32, 32>}]} {
    %c0 = arith.constant 0 : index
    %c0_0 = arith.constant 0 : index
    %0 = vector.load %arg1[%c0, %c0_0] : memref<32x32xf32, #tpu.memory_space<vmem>>, vector<32x32xf32>
    %cst = arith.constant dense<0.000000e+00> : vector<32xf32>
    %1 = vector.multi_reduction <add>, %0, %cst [1] : vector<32x32xf32> to vector<32xf32>
    %2 = vector.shape_cast %1 : vector<32xf32> to vector<32x1xf32>
    %cst_1 = arith.constant 3.200000e+01 : f32
    %3 = vector.broadcast %cst_1 : f32 to vector<32x1xf32>
    %4 = arith.divf %2, %3 : vector<32x1xf32>
    %5 = vector.broadcast %4 : vector<32x1xf32> to vector<32x32xf32>
    %6 = arith.subf %0, %5 : vector<32x32xf32>
    %7 = arith.mulf %6, %6 : vector<32x32xf32>
    %cst_2 = arith.constant dense<0.000000e+00> : vector<32xf32>
    %8 = vector.multi_reduction <add>, %7, %cst_2 [1] : vector<32x32xf32> to vector<32xf32>
    %9 = vector.shape_cast %8 : vector<32xf32> to vector<32x1xf32>
    %cst_3 = arith.constant 3.200000e+01 : f32
    %10 = vector.broadcast %cst_3 : f32 to vector<32x1xf32>
    %11 = arith.divf %9, %10 : vector<32x1xf32>
    %cst_4 = arith.constant 9.99999974E-6 : f32
    %12 = vector.broadcast %cst_4 : f32 to vector<32x1xf32>
    %13 = arith.addf %11, %12 : vector<32x1xf32>
    %14 = math.rsqrt %13 : vector<32x1xf32>
    %15 = vector.broadcast %14 : vector<32x1xf32> to vector<32x32xf32>
    %16 = arith.mulf %6, %15 : vector<32x32xf32>
    %c0_5 = arith.constant 0 : index
    %c0_6 = arith.constant 0 : index
    %17 = vector.load %arg2[%c0_5, %c0_6] : memref<1x32xf32, #tpu.memory_space<vmem>>, vector<1x32xf32>
    %18 = vector.broadcast %17 : vector<1x32xf32> to vector<32x32xf32>
    %19 = arith.mulf %16, %18 : vector<32x32xf32>
    %c0_7 = arith.constant 0 : index
    %c0_8 = arith.constant 0 : index
    %20 = vector.load %arg3[%c0_7, %c0_8] : memref<1x32xf32, #tpu.memory_space<vmem>>, vector<1x32xf32>
    %21 = vector.broadcast %20 : vector<1x32xf32> to vector<32x32xf32>
    %22 = arith.addf %19, %21 : vector<32x32xf32>
    %23 = arith.truncf %22 : vector<32x32xf32> to vector<32x32xbf16>
    %c0_9 = arith.constant 0 : index
    %c0_10 = arith.constant 0 : index
    %24 = vector.load %arg4[%c0_9, %c0_10] : memref<32x32xbf16, #tpu.memory_space<vmem>>, vector<32x32xbf16>
    tpu.vector_store %arg4[%c0_9, %c0_10], %23 {strides = array<i32>} : memref<32x32xbf16, #tpu.memory_space<vmem>>, vector<32x32xbf16>,
    return
  }
  func.func @transform_0(%arg0: i32) -> (i32, i32) {
    %c0_i32 = arith.constant 0 : i32
    %c0_i32_0 = arith.constant 0 : i32
    return %arg0, %c0_i32 : i32, i32
  }
  func.func @transform_1(%arg0: i32) -> (i32, i32) {
    %c0_i32 = arith.constant 0 : i32
    %c0_i32_0 = arith.constant 0 : i32
    %c0_i32_1 = arith.constant 0 : i32
    return %c0_i32, %c0_i32_0 : i32, i32
  }
  func.func @transform_2(%arg0: i32) -> (i32, i32) {
    %c0_i32 = arith.constant 0 : i32
    %c0_i32_0 = arith.constant 0 : i32
    %c0_i32_1 = arith.constant 0 : i32
    return %c0_i32, %c0_i32_0 : i32, i32
  }
  func.func @transform_3(%arg0: i32) -> (i32, i32) {
    %c0_i32 = arith.constant 0 : i32
    %c0_i32_0 = arith.constant 0 : i32
    return %arg0, %c0_i32 : i32, i32
  }
}

module attributes {stable_mosaic.version = 11 : i64} {
  func.func @_linear_kernel(%arg0: i32, %arg1: i32, %arg2: memref<32x32xbf16, #tpu.memory_space<vmem>>, %arg3: memref<32x32xbf16, #tpu.memory_space<vmem>>, %arg4: memref<1x32xf32, #tpu.memory_space<vmem>>, %arg5: memref<32x32xbf16, #tpu.memory_space<vmem>>) attributes {dimension_semantics = [#tpu.dimension_semantics<parallel>, #tpu.dimension_semantics<parallel>], iteration_bounds = array<i64: 1, 1>, scalar_prefetch = 0 : i64, scratch_operands = 0 : i64, tpu.core_type = #tpu.core_type<tc>, window_params = [{transform_indices = @transform_0, window_bounds = array<i64: 32, 32>}, {transform_indices = @transform_1, window_bounds = array<i64: 32, 32>}, {transform_indices = @transform_2, window_bounds = array<i64: 1, 32>}, {transform_indices = @transform_3, window_bounds = array<i64: 32, 32>}]} {
    %c0 = arith.constant 0 : index
    %c0_0 = arith.constant 0 : index
    %0 = vector.load %arg2[%c0, %c0_0] : memref<32x32xbf16, #tpu.memory_space<vmem>>, vector<32x32xbf16>
    %c0_1 = arith.constant 0 : index
    %c0_2 = arith.constant 0 : index
    %1 = vector.load %arg3[%c0_1, %c0_2] : memref<32x32xbf16, #tpu.memory_space<vmem>>, vector<32x32xbf16>
    %cst = arith.constant dense<0.000000e+00> : vector<32x32xf32>
    %2 = tpu.matmul %0, %1, %cst {dimension_numbers = #tpu.dot_dimension_numbers<[1], [0], [0], [1], [0, 0, 1, 1], [], []>} : vector<32x32xbf16>, vector<32x32xbf16>, vector<32x32xf32> -> vector<32x32xf32>
    %c0_3 = arith.constant 0 : index
    %c0_4 = arith.constant 0 : index
    %3 = vector.load %arg4[%c0_3, %c0_4] : memref<1x32xf32, #tpu.memory_space<vmem>>, vector<1x32xf32>
    %4 = vector.broadcast %3 : vector<1x32xf32> to vector<32x32xf32>
    %5 = arith.addf %2, %4 : vector<32x32xf32>
    %6 = arith.truncf %5 : vector<32x32xf32> to vector<32x32xbf16>
    %c0_5 = arith.constant 0 : index
    %c0_6 = arith.constant 0 : index
    %7 = vector.load %arg5[%c0_5, %c0_6] : memref<32x32xbf16, #tpu.memory_space<vmem>>, vector<32x32xbf16>
    tpu.vector_store %arg5[%c0_5, %c0_6], %6 {strides = array<i32>} : memref<32x32xbf16, #tpu.memory_space<vmem>>, vector<32x32xbf16>,
    return
  }
  func.func @transform_0(%arg0: i32, %arg1: i32) -> (i32, i32) {
    %c0_i32 = arith.constant 0 : i32
    %c0_i32_0 = arith.constant 0 : i32
    return %arg0, %c0_i32 : i32, i32
  }
  func.func @transform_1(%arg0: i32, %arg1: i32) -> (i32, i32) {
    %c0_i32 = arith.constant 0 : i32
    %c0_i32_0 = arith.constant 0 : i32
    return %c0_i32, %arg1 : i32, i32
  }
  func.func @transform_2(%arg0: i32, %arg1: i32) -> (i32, i32) {
    %c0_i32 = arith.constant 0 : i32
    %c0_i32_0 = arith.constant 0 : i32
    return %c0_i32, %arg1 : i32, i32
  }
  func.func @transform_3(%arg0: i32, %arg1: i32) -> (i32, i32) {
    %c0_i32 = arith.constant 0 : i32
    return %arg0, %arg1 : i32, i32
  }
}

module attributes {stable_mosaic.version = 11 : i64} {
  func.func @_lsh_bucket_attn_kernel(%arg0: i32, %arg1: i32, %arg2: memref<1x8x4x8xbf16, #tpu.memory_space<vmem>>, %arg3: memref<1x1x4x8xbf16, #tpu.memory_space<vmem>>, %arg4: memref<1x8x4x8xbf16, #tpu.memory_space<vmem>>, %arg5: memref<1x1x4x8xbf16, #tpu.memory_space<vmem>>, %arg6: memref<1x8x4x1xi32, #tpu.memory_space<vmem>>, %arg7: memref<1x1x4x1xi32, #tpu.memory_space<vmem>>, %arg8: memref<1x8x4x8xbf16, #tpu.memory_space<vmem>>, %arg9: memref<1x1x8x4xf32, #tpu.memory_space<vmem>>) attributes {dimension_semantics = [#tpu.dimension_semantics<parallel>, #tpu.dimension_semantics<parallel>], iteration_bounds = array<i64: 8, 1>, scalar_prefetch = 0 : i64, scratch_operands = 0 : i64, tpu.core_type = #tpu.core_type<tc>, window_params = [{transform_indices = @transform_0, window_bounds = array<i64: 1, 8, 4, 8>}, {transform_indices = @transform_1, window_bounds = array<i64: 1, 1, 4, 8>}, {transform_indices = @transform_2, window_bounds = array<i64: 1, 8, 4, 8>}, {transform_indices = @transform_3, window_bounds = array<i64: 1, 1, 4, 8>}, {transform_indices = @transform_4, window_bounds = array<i64: 1, 8, 4, 1>}, {transform_indices = @transform_5, window_bounds = array<i64: 1, 1, 4, 1>}, {transform_indices = @transform_6, window_bounds = array<i64: 1, 8, 4, 8>}, {transform_indices = @transform_7, window_bounds = array<i64: 1, 1, 8, 4>}]} {
    %c0 = arith.constant 0 : index
    %c0_0 = arith.constant 0 : index
    %c0_1 = arith.constant 0 : index
    %c0_2 = arith.constant 0 : index
    %0 = vector.load %arg2[%c0, %c0_0, %c0_1, %c0_2] : memref<1x8x4x8xbf16, #tpu.memory_space<vmem>>, vector<1x8x4x8xbf16>
    %1 = vector.shape_cast %0 : vector<1x8x4x8xbf16> to vector<8x4x8xbf16>
    %c0_3 = arith.constant 0 : index
    %c0_4 = arith.constant 0 : index
    %c0_5 = arith.constant 0 : index
    %c0_6 = arith.constant 0 : index
    %2 = vector.load %arg3[%c0_3, %c0_4, %c0_5, %c0_6] : memref<1x1x4x8xbf16, #tpu.memory_space<vmem>>, vector<1x1x4x8xbf16>
    %3 = vector.shape_cast %2 : vector<1x1x4x8xbf16> to vector<4x8xbf16>
    %c0_7 = arith.constant 0 : index
    %c0_8 = arith.constant 0 : index
    %c0_9 = arith.constant 0 : index
    %c0_10 = arith.constant 0 : index
    %4 = vector.load %arg4[%c0_7, %c0_8, %c0_9, %c0_10] : memref<1x8x4x8xbf16, #tpu.memory_space<vmem>>, vector<1x8x4x8xbf16>
    %5 = vector.shape_cast %4 : vector<1x8x4x8xbf16> to vector<8x4x8xbf16>
    %c0_11 = arith.constant 0 : index
    %c0_12 = arith.constant 0 : index
    %c0_13 = arith.constant 0 : index
    %c0_14 = arith.constant 0 : index
    %6 = vector.load %arg5[%c0_11, %c0_12, %c0_13, %c0_14] : memref<1x1x4x8xbf16, #tpu.memory_space<vmem>>, vector<1x1x4x8xbf16>
    %7 = vector.shape_cast %6 : vector<1x1x4x8xbf16> to vector<4x8xbf16>
    %c0_15 = arith.constant 0 : index
    %c0_16 = arith.constant 0 : index
    %c0_17 = arith.constant 0 : index
    %c0_18 = arith.constant 0 : index
    %8 = vector.load %arg6[%c0_15, %c0_16, %c0_17, %c0_18] : memref<1x8x4x1xi32, #tpu.memory_space<vmem>>, vector<1x8x4x1xi32>
    %9 = vector.shape_cast %8 : vector<1x8x4x1xi32> to vector<8x4xi32>
    %c0_19 = arith.constant 0 : index
    %c0_20 = arith.constant 0 : index
    %c0_21 = arith.constant 0 : index
    %c0_22 = arith.constant 0 : index
    %10 = vector.load %arg7[%c0_19, %c0_20, %c0_21, %c0_22] : memref<1x1x4x1xi32, #tpu.memory_space<vmem>>, vector<1x1x4x1xi32>
    %11 = vector.shape_cast %10 : vector<1x1x4x1xi32> to vector<4xi32>
    %12 = vector.shape_cast %3 : vector<4x8xbf16> to vector<1x4x8xbf16>
    %13 = vector.extract_strided_slice %1 {offsets = [0, 0, 0], sizes = [7, 4, 8], strides = [1, 1, 1]} : vector<8x4x8xbf16> to vector<7x4x8xbf16>
    %14 = tpu.concatenate %12, %13 in 0 : vector<1x4x8xbf16>, vector<7x4x8xbf16> -> vector<8x4x8xbf16>
    %15 = vector.shape_cast %7 : vector<4x8xbf16> to vector<1x4x8xbf16>
    %16 = vector.extract_strided_slice %5 {offsets = [0, 0, 0], sizes = [7, 4, 8], strides = [1, 1, 1]} : vector<8x4x8xbf16> to vector<7x4x8xbf16>
    %17 = tpu.concatenate %15, %16 in 0 : vector<1x4x8xbf16>, vector<7x4x8xbf16> -> vector<8x4x8xbf16>
    %18 = vector.shape_cast %11 : vector<4xi32> to vector<1x4xi32>
    %19 = vector.extract_strided_slice %9 {offsets = [0, 0], sizes = [7, 4], strides = [1, 1]} : vector<8x4xi32> to vector<7x4xi32>
    %20 = tpu.concatenate %18, %19 in 0 : vector<1x4xi32>, vector<7x4xi32> -> vector<8x4xi32>
    %21 = arith.extf %1 : vector<8x4x8xbf16> to vector<8x4x8xf32>
    %22 = arith.mulf %21, %21 : vector<8x4x8xf32>
    %cst = arith.constant dense<0.000000e+00> : vector<8x4xf32>
    %23 = vector.multi_reduction <add>, %22, %cst [2] : vector<8x4x8xf32> to vector<8x4xf32>
    %24 = arith.extf %3 : vector<4x8xbf16> to vector<4x8xf32>
    %25 = arith.mulf %24, %24 : vector<4x8xf32>
    %cst_23 = arith.constant dense<0.000000e+00> : vector<4xf32>
    %26 = vector.multi_reduction <add>, %25, %cst_23 [1] : vector<4x8xf32> to vector<4xf32>
    %27 = vector.shape_cast %26 : vector<4xf32> to vector<1x4xf32>
    %28 = vector.extract_strided_slice %23 {offsets = [0, 0], sizes = [7, 4], strides = [1, 1]} : vector<8x4xf32> to vector<7x4xf32>
    %29 = tpu.concatenate %27, %28 in 0 : vector<1x4xf32>, vector<7x4xf32> -> vector<8x4xf32>
    %30 = math.sqrt %23 : vector<8x4xf32>
    %cst_24 = arith.constant 9.99999997E-7 : f32
    %31 = vector.broadcast %cst_24 : f32 to vector<8x4xf32>
    %32 = arith.addf %30, %31 : vector<8x4xf32>
    %cst_25 = arith.constant 0.353553385 : f32
    %33 = vector.broadcast %cst_25 : f32 to vector<8x4xf32>
    %34 = arith.divf %33, %32 : vector<8x4xf32>
    %35 = math.sqrt %29 : vector<8x4xf32>
    %cst_26 = arith.constant 9.99999997E-7 : f32
    %36 = vector.broadcast %cst_26 : f32 to vector<8x4xf32>
    %37 = arith.addf %35, %36 : vector<8x4xf32>
    %cst_27 = arith.constant 0.353553385 : f32
    %38 = vector.broadcast %cst_27 : f32 to vector<8x4xf32>
    %39 = arith.divf %38, %37 : vector<8x4xf32>
    "tpu.trace_start"() <{level = 10 : i32, message = "gcd,gkd->gck"}> : () -> ()
    %cst_28 = arith.constant dense<0.000000e+00> : vector<8x4x4xf32>
    %40 = tpu.matmul %1, %1, %cst_28 {dimension_numbers = #tpu.dot_dimension_numbers<[2], [2], [1], [1], [0, 0, 0, 1, 1, 1], [0], [0]>} : vector<8x4x8xbf16>, vector<8x4x8xbf16>, vector<8x4x4xf32> -> vector<8x4x4xf32>
    "tpu.trace_stop"() : () -> ()
    %41 = vector.shape_cast %34 : vector<8x4xf32> to vector<8x1x4xf32>
    %42 = vector.broadcast %41 : vector<8x1x4xf32> to vector<8x4x4xf32>
    %43 = arith.mulf %40, %42 : vector<8x4x4xf32>
    "tpu.trace_start"() <{level = 10 : i32, message = "gcd,gkd->gck"}> : () -> ()
    %cst_29 = arith.constant dense<0.000000e+00> : vector<8x4x4xf32>
    %44 = tpu.matmul %1, %14, %cst_29 {dimension_numbers = #tpu.dot_dimension_numbers<[2], [2], [1], [1], [0, 0, 0, 1, 1, 1], [0], [0]>} : vector<8x4x8xbf16>, vector<8x4x8xbf16>, vector<8x4x4xf32> -> vector<8x4x4xf32>
    "tpu.trace_stop"() : () -> ()
    %45 = vector.shape_cast %39 : vector<8x4xf32> to vector<8x1x4xf32>
    %46 = vector.broadcast %45 : vector<8x1x4xf32> to vector<8x4x4xf32>
    %47 = arith.mulf %44, %46 : vector<8x4x4xf32>
    %48 = vector.shape_cast %9 : vector<8x4xi32> to vector<8x4x1xi32>
    %49 = vector.shape_cast %9 : vector<8x4xi32> to vector<8x1x4xi32>
    %50 = vector.broadcast %48 : vector<8x4x1xi32> to vector<8x4x4xi32>
    %51 = vector.broadcast %49 : vector<8x1x4xi32> to vector<8x4x4xi32>
    %52 = arith.cmpi eq, %50, %51 : vector<8x4x4xi32>
    %cst_30 = arith.constant -1.000000e+05 : f32
    %53 = vector.broadcast %cst_30 : f32 to vector<8x4x4xf32>
    %54 = arith.select %52, %53, %43 : vector<8x4x4xi1>, vector<8x4x4xf32>
    %55 = vector.shape_cast %9 : vector<8x4xi32> to vector<8x4x1xi32>
    %56 = vector.shape_cast %20 : vector<8x4xi32> to vector<8x1x4xi32>
    %57 = vector.broadcast %55 : vector<8x4x1xi32> to vector<8x4x4xi32>
    %58 = vector.broadcast %56 : vector<8x1x4xi32> to vector<8x4x4xi32>
    %59 = arith.cmpi eq, %57, %58 : vector<8x4x4xi32>
    %cst_31 = arith.constant -1.000000e+05 : f32
    %60 = vector.broadcast %cst_31 : f32 to vector<8x4x4xf32>
    %61 = arith.select %59, %60, %47 : vector<8x4x4xi1>, vector<8x4x4xf32>
    %cst_32 = arith.constant dense<0xFF800000> : vector<8x4xf32>
    %62 = vector.multi_reduction <maximumf>, %54, %cst_32 [2] : vector<8x4x4xf32> to vector<8x4xf32>
    %63 = vector.shape_cast %62 : vector<8x4xf32> to vector<8x4x1xf32>
    %cst_33 = arith.constant dense<0xFF800000> : vector<8x4xf32>
    %64 = vector.multi_reduction <maximumf>, %61, %cst_33 [2] : vector<8x4x4xf32> to vector<8x4xf32>
    %65 = vector.shape_cast %64 : vector<8x4xf32> to vector<8x4x1xf32>
    %66 = arith.maximumf %63, %65 : vector<8x4x1xf32>
    %67 = vector.broadcast %66 : vector<8x4x1xf32> to vector<8x4x4xf32>
    %68 = arith.subf %54, %67 : vector<8x4x4xf32>
    %69 = math.exp %68 : vector<8x4x4xf32>
    %70 = vector.broadcast %66 : vector<8x4x1xf32> to vector<8x4x4xf32>
    %71 = arith.subf %61, %70 : vector<8x4x4xf32>
    %72 = math.exp %71 : vector<8x4x4xf32>
    %cst_34 = arith.constant dense<0.000000e+00> : vector<8x4xf32>
    %73 = vector.multi_reduction <add>, %69, %cst_34 [2] : vector<8x4x4xf32> to vector<8x4xf32>
    %74 = vector.shape_cast %73 : vector<8x4xf32> to vector<8x4x1xf32>
    %cst_35 = arith.constant dense<0.000000e+00> : vector<8x4xf32>
    %75 = vector.multi_reduction <add>, %72, %cst_35 [2] : vector<8x4x4xf32> to vector<8x4xf32>
    %76 = vector.shape_cast %75 : vector<8x4xf32> to vector<8x4x1xf32>
    %77 = arith.addf %74, %76 : vector<8x4x1xf32>
    %78 = math.log %77 : vector<8x4x1xf32>
    %79 = arith.addf %66, %78 : vector<8x4x1xf32>
    %cst_36 = arith.constant 1.000000e+00 : f32
    %80 = vector.broadcast %cst_36 : f32 to vector<8x4x1xf32>
    %81 = arith.divf %80, %77 : vector<8x4x1xf32>
    %82 = vector.broadcast %81 : vector<8x4x1xf32> to vector<8x4x4xf32>
    %83 = arith.mulf %69, %82 : vector<8x4x4xf32>
    %84 = arith.truncf %83 : vector<8x4x4xf32> to vector<8x4x4xbf16>
    "tpu.trace_start"() <{level = 10 : i32, message = "gck,gkd->gcd"}> : () -> ()
    %cst_37 = arith.constant dense<0.000000e+00> : vector<8x4x8xf32>
    %85 = tpu.matmul %84, %5, %cst_37 {dimension_numbers = #tpu.dot_dimension_numbers<[2], [1], [1], [2], [0, 0, 0, 1, 1, 2], [0], [0]>} : vector<8x4x4xbf16>, vector<8x4x8xbf16>, vector<8x4x8xf32> -> vector<8x4x8xf32>
    "tpu.trace_stop"() : () -> ()
    %86 = vector.broadcast %81 : vector<8x4x1xf32> to vector<8x4x4xf32>
    %87 = arith.mulf %72, %86 : vector<8x4x4xf32>
    %88 = arith.truncf %87 : vector<8x4x4xf32> to vector<8x4x4xbf16>
    "tpu.trace_start"() <{level = 10 : i32, message = "gck,gkd->gcd"}> : () -> ()
    %cst_38 = arith.constant dense<0.000000e+00> : vector<8x4x8xf32>
    %89 = tpu.matmul %88, %17, %cst_38 {dimension_numbers = #tpu.dot_dimension_numbers<[2], [1], [1], [2], [0, 0, 0, 1, 1, 2], [0], [0]>} : vector<8x4x4xbf16>, vector<8x4x8xbf16>, vector<8x4x8xf32> -> vector<8x4x8xf32>
    "tpu.trace_stop"() : () -> ()
    %90 = arith.addf %85, %89 : vector<8x4x8xf32>
    %91 = vector.shape_cast %90 : vector<8x4x8xf32> to vector<1x8x4x8xf32>
    %92 = arith.truncf %91 : vector<1x8x4x8xf32> to vector<1x8x4x8xbf16>
    %c0_39 = arith.constant 0 : index
    %c0_40 = arith.constant 0 : index
    %c0_41 = arith.constant 0 : index
    %c0_42 = arith.constant 0 : index
    %93 = vector.load %arg8[%c0_39, %c0_40, %c0_41, %c0_42] : memref<1x8x4x8xbf16, #tpu.memory_space<vmem>>, vector<1x8x4x8xbf16>
    tpu.vector_store %arg8[%c0_39, %c0_40, %c0_41, %c0_42], %92 {strides = array<i32>} : memref<1x8x4x8xbf16, #tpu.memory_space<vmem>>, vector<1x8x4x8xbf16>,
    %94 = vector.shape_cast %79 : vector<8x4x1xf32> to vector<8x4xf32>
    %95 = vector.shape_cast %94 : vector<8x4xf32> to vector<1x1x8x4xf32>
    %c0_43 = arith.constant 0 : index
    %c0_44 = arith.constant 0 : index
    %c0_45 = arith.constant 0 : index
    %c0_46 = arith.constant 0 : index
    %96 = vector.load %arg9[%c0_43, %c0_44, %c0_45, %c0_46] : memref<1x1x8x4xf32, #tpu.memory_space<vmem>>, vector<1x1x8x4xf32>
    tpu.vector_store %arg9[%c0_43, %c0_44, %c0_45, %c0_46], %95 {strides = array<i32>} : memref<1x1x8x4xf32, #tpu.memory_space<vmem>>, vector<1x1x8x4xf32>,
    return
  }
  func.func @transform_0(%arg0: i32, %arg1: i32) -> (i32, i32, i32, i32) {
    %c0_i32 = arith.constant 0 : i32
    %c0_i32_0 = arith.constant 0 : i32
    %c0_i32_1 = arith.constant 0 : i32
    return %arg0, %arg1, %c0_i32, %c0_i32_0 : i32, i32, i32, i32
  }
  func.func @transform_1(%arg0: i32, %arg1: i32) -> (i32, i32, i32, i32) {
    %c8_i32 = arith.constant 8 : i32
    %0 = arith.muli %arg1, %c8_i32 : i32
    %c8_i32_0 = arith.constant 8 : i32
    %1 = arith.addi %0, %c8_i32_0 : i32
    %c1_i32 = arith.constant 1 : i32
    %2 = arith.subi %1, %c1_i32 : i32
    %c8_i32_1 = arith.constant 8 : i32
    %c0_i32 = arith.constant 0 : i32
    %3 = arith.cmpi eq, %c8_i32_1, %c0_i32 : i32
    %c1_i32_2 = arith.constant 1 : i32
    %4 = arith.select %3, %c1_i32_2, %c8_i32_1 : i32
    %5 = arith.remsi %2, %4 : i32
    %c0_i32_3 = arith.constant 0 : i32
    %6 = arith.cmpi ne, %5, %c0_i32_3 : i32
    %c0_i32_4 = arith.constant 0 : i32
    %7 = arith.cmpi slt, %5, %c0_i32_4 : i32
    %c0_i32_5 = arith.constant 0 : i32
    %8 = arith.cmpi slt, %4, %c0_i32_5 : i32
    %9 = arith.xori %7, %8 : i1
    %10 = arith.andi %9, %6 : i1
    %11 = arith.addi %5, %4 : i32
    %12 = arith.select %10, %11, %5 : i32
    %c0_i32_6 = arith.constant 0 : i32
    %c0_i32_7 = arith.constant 0 : i32
    %c0_i32_8 = arith.constant 0 : i32
    return %arg0, %12, %c0_i32_6, %c0_i32_7 : i32, i32, i32, i32
  }
  func.func @transform_2(%arg0: i32, %arg1: i32) -> (i32, i32, i32, i32) {
    %c0_i32 = arith.constant 0 : i32
    %c0_i32_0 = arith.constant 0 : i32
    %c0_i32_1 = arith.constant 0 : i32
    return %arg0, %arg1, %c0_i32, %c0_i32_0 : i32, i32, i32, i32
  }
  func.func @transform_3(%arg0: i32, %arg1: i32) -> (i32, i32, i32, i32) {
    %c8_i32 = arith.constant 8 : i32
    %0 = arith.muli %arg1, %c8_i32 : i32
    %c8_i32_0 = arith.constant 8 : i32
    %1 = arith.addi %0, %c8_i32_0 : i32
    %c1_i32 = arith.constant 1 : i32
    %2 = arith.subi %1, %c1_i32 : i32
    %c8_i32_1 = arith.constant 8 : i32
    %c0_i32 = arith.constant 0 : i32
    %3 = arith.cmpi eq, %c8_i32_1, %c0_i32 : i32
    %c1_i32_2 = arith.constant 1 : i32
    %4 = arith.select %3, %c1_i32_2, %c8_i32_1 : i32
    %5 = arith.remsi %2, %4 : i32
    %c0_i32_3 = arith.constant 0 : i32
    %6 = arith.cmpi ne, %5, %c0_i32_3 : i32
    %c0_i32_4 = arith.constant 0 : i32
    %7 = arith.cmpi slt, %5, %c0_i32_4 : i32
    %c0_i32_5 = arith.constant 0 : i32
    %8 = arith.cmpi slt, %4, %c0_i32_5 : i32
    %9 = arith.xori %7, %8 : i1
    %10 = arith.andi %9, %6 : i1
    %11 = arith.addi %5, %4 : i32
    %12 = arith.select %10, %11, %5 : i32
    %c0_i32_6 = arith.constant 0 : i32
    %c0_i32_7 = arith.constant 0 : i32
    %c0_i32_8 = arith.constant 0 : i32
    return %arg0, %12, %c0_i32_6, %c0_i32_7 : i32, i32, i32, i32
  }
  func.func @transform_4(%arg0: i32, %arg1: i32) -> (i32, i32, i32, i32) {
    %c0_i32 = arith.constant 0 : i32
    %c0_i32_0 = arith.constant 0 : i32
    %c0_i32_1 = arith.constant 0 : i32
    return %arg0, %arg1, %c0_i32, %c0_i32_0 : i32, i32, i32, i32
  }
  func.func @transform_5(%arg0: i32, %arg1: i32) -> (i32, i32, i32, i32) {
    %c8_i32 = arith.constant 8 : i32
    %0 = arith.muli %arg1, %c8_i32 : i32
    %c8_i32_0 = arith.constant 8 : i32
    %1 = arith.addi %0, %c8_i32_0 : i32
    %c1_i32 = arith.constant 1 : i32
    %2 = arith.subi %1, %c1_i32 : i32
    %c8_i32_1 = arith.constant 8 : i32
    %c0_i32 = arith.constant 0 : i32
    %3 = arith.cmpi eq, %c8_i32_1, %c0_i32 : i32
    %c1_i32_2 = arith.constant 1 : i32
    %4 = arith.select %3, %c1_i32_2, %c8_i32_1 : i32
    %5 = arith.remsi %2, %4 : i32
    %c0_i32_3 = arith.constant 0 : i32
    %6 = arith.cmpi ne, %5, %c0_i32_3 : i32
    %c0_i32_4 = arith.constant 0 : i32
    %7 = arith.cmpi slt, %5, %c0_i32_4 : i32
    %c0_i32_5 = arith.constant 0 : i32
    %8 = arith.cmpi slt, %4, %c0_i32_5 : i32
    %9 = arith.xori %7, %8 : i1
    %10 = arith.andi %9, %6 : i1
    %11 = arith.addi %5, %4 : i32
    %12 = arith.select %10, %11, %5 : i32
    %c0_i32_6 = arith.constant 0 : i32
    %c0_i32_7 = arith.constant 0 : i32
    %c0_i32_8 = arith.constant 0 : i32
    return %arg0, %12, %c0_i32_6, %c0_i32_7 : i32, i32, i32, i32
  }
  func.func @transform_6(%arg0: i32, %arg1: i32) -> (i32, i32, i32, i32) {
    %c0_i32 = arith.constant 0 : i32
    %c0_i32_0 = arith.constant 0 : i32
    %c0_i32_1 = arith.constant 0 : i32
    return %arg0, %arg1, %c0_i32, %c0_i32_0 : i32, i32, i32, i32
  }
  func.func @transform_7(%arg0: i32, %arg1: i32) -> (i32, i32, i32, i32) {
    %c0_i32 = arith.constant 0 : i32
    %c0_i32_0 = arith.constant 0 : i32
    %c0_i32_1 = arith.constant 0 : i32
    return %arg0, %arg1, %c0_i32, %c0_i32_0 : i32, i32, i32, i32
  }
}

module attributes {stable_mosaic.version = 11 : i64} {
  func.func @_linear_kernel(%arg0: i32, %arg1: i32, %arg2: memref<32x32xbf16, #tpu.memory_space<vmem>>, %arg3: memref<32x32xbf16, #tpu.memory_space<vmem>>, %arg4: memref<1x32xf32, #tpu.memory_space<vmem>>, %arg5: memref<32x32xf32, #tpu.memory_space<vmem>>) attributes {dimension_semantics = [#tpu.dimension_semantics<parallel>, #tpu.dimension_semantics<parallel>], iteration_bounds = array<i64: 1, 1>, scalar_prefetch = 0 : i64, scratch_operands = 0 : i64, tpu.core_type = #tpu.core_type<tc>, window_params = [{transform_indices = @transform_0, window_bounds = array<i64: 32, 32>}, {transform_indices = @transform_1, window_bounds = array<i64: 32, 32>}, {transform_indices = @transform_2, window_bounds = array<i64: 1, 32>}, {transform_indices = @transform_3, window_bounds = array<i64: 32, 32>}]} {
    %c0 = arith.constant 0 : index
    %c0_0 = arith.constant 0 : index
    %0 = vector.load %arg2[%c0, %c0_0] : memref<32x32xbf16, #tpu.memory_space<vmem>>, vector<32x32xbf16>
    %c0_1 = arith.constant 0 : index
    %c0_2 = arith.constant 0 : index
    %1 = vector.load %arg3[%c0_1, %c0_2] : memref<32x32xbf16, #tpu.memory_space<vmem>>, vector<32x32xbf16>
    %cst = arith.constant dense<0.000000e+00> : vector<32x32xf32>
    %2 = tpu.matmul %0, %1, %cst {dimension_numbers = #tpu.dot_dimension_numbers<[1], [0], [0], [1], [0, 0, 1, 1], [], []>} : vector<32x32xbf16>, vector<32x32xbf16>, vector<32x32xf32> -> vector<32x32xf32>
    %c0_3 = arith.constant 0 : index
    %c0_4 = arith.constant 0 : index
    %3 = vector.load %arg4[%c0_3, %c0_4] : memref<1x32xf32, #tpu.memory_space<vmem>>, vector<1x32xf32>
    %4 = vector.broadcast %3 : vector<1x32xf32> to vector<32x32xf32>
    %5 = arith.addf %2, %4 : vector<32x32xf32>
    %c0_5 = arith.constant 0 : index
    %c0_6 = arith.constant 0 : index
    %6 = vector.load %arg5[%c0_5, %c0_6] : memref<32x32xf32, #tpu.memory_space<vmem>>, vector<32x32xf32>
    tpu.vector_store %arg5[%c0_5, %c0_6], %5 {strides = array<i32>} : memref<32x32xf32, #tpu.memory_space<vmem>>, vector<32x32xf32>,
    return
  }
  func.func @transform_0(%arg0: i32, %arg1: i32) -> (i32, i32) {
    %c0_i32 = arith.constant 0 : i32
    %c0_i32_0 = arith.constant 0 : i32
    return %arg0, %c0_i32 : i32, i32
  }
  func.func @transform_1(%arg0: i32, %arg1: i32) -> (i32, i32) {
    %c0_i32 = arith.constant 0 : i32
    %c0_i32_0 = arith.constant 0 : i32
    return %c0_i32, %arg1 : i32, i32
  }
  func.func @transform_2(%arg0: i32, %arg1: i32) -> (i32, i32) {
    %c0_i32 = arith.constant 0 : i32
    %c0_i32_0 = arith.constant 0 : i32
    return %c0_i32, %arg1 : i32, i32
  }
  func.func @transform_3(%arg0: i32, %arg1: i32) -> (i32, i32) {
    %c0_i32 = arith.constant 0 : i32
    return %arg0, %arg1 : i32, i32
  }
}

module attributes {stable_mosaic.version = 11 : i64} {
  func.func @_linear_kernel(%arg0: i32, %arg1: i32, %arg2: memref<32x32xbf16, #tpu.memory_space<vmem>>, %arg3: memref<32x128xbf16, #tpu.memory_space<vmem>>, %arg4: memref<1x128xf32, #tpu.memory_space<vmem>>, %arg5: memref<32x128xbf16, #tpu.memory_space<vmem>>) attributes {dimension_semantics = [#tpu.dimension_semantics<parallel>, #tpu.dimension_semantics<parallel>], iteration_bounds = array<i64: 1, 1>, scalar_prefetch = 0 : i64, scratch_operands = 0 : i64, tpu.core_type = #tpu.core_type<tc>, window_params = [{transform_indices = @transform_0, window_bounds = array<i64: 32, 32>}, {transform_indices = @transform_1, window_bounds = array<i64: 32, 128>}, {transform_indices = @transform_2, window_bounds = array<i64: 1, 128>}, {transform_indices = @transform_3, window_bounds = array<i64: 32, 128>}]} {
    %c0 = arith.constant 0 : index
    %c0_0 = arith.constant 0 : index
    %0 = vector.load %arg2[%c0, %c0_0] : memref<32x32xbf16, #tpu.memory_space<vmem>>, vector<32x32xbf16>
    %c0_1 = arith.constant 0 : index
    %c0_2 = arith.constant 0 : index
    %1 = vector.load %arg3[%c0_1, %c0_2] : memref<32x128xbf16, #tpu.memory_space<vmem>>, vector<32x128xbf16>
    %cst = arith.constant dense<0.000000e+00> : vector<32x128xf32>
    %2 = tpu.matmul %0, %1, %cst {dimension_numbers = #tpu.dot_dimension_numbers<[1], [0], [0], [1], [0, 0, 1, 1], [], []>} : vector<32x32xbf16>, vector<32x128xbf16>, vector<32x128xf32> -> vector<32x128xf32>
    %c0_3 = arith.constant 0 : index
    %c0_4 = arith.constant 0 : index
    %3 = vector.load %arg4[%c0_3, %c0_4] : memref<1x128xf32, #tpu.memory_space<vmem>>, vector<1x128xf32>
    %4 = vector.broadcast %3 : vector<1x128xf32> to vector<32x128xf32>
    %5 = arith.addf %2, %4 : vector<32x128xf32>
    %cst_5 = arith.constant 5.000000e-01 : f32
    %6 = vector.broadcast %cst_5 : f32 to vector<32x128xf32>
    %7 = arith.mulf %6, %5 : vector<32x128xf32>
    %cst_6 = arith.constant 0.707106769 : f32
    %8 = vector.broadcast %cst_6 : f32 to vector<32x128xf32>
    %9 = arith.mulf %5, %8 : vector<32x128xf32>
    %10 = math.erf %9 : vector<32x128xf32>
    %cst_7 = arith.constant 1.000000e+00 : f32
    %11 = vector.broadcast %cst_7 : f32 to vector<32x128xf32>
    %12 = arith.addf %11, %10 : vector<32x128xf32>
    %13 = arith.mulf %7, %12 : vector<32x128xf32>
    %14 = arith.truncf %13 : vector<32x128xf32> to vector<32x128xbf16>
    %c0_8 = arith.constant 0 : index
    %c0_9 = arith.constant 0 : index
    %15 = vector.load %arg5[%c0_8, %c0_9] : memref<32x128xbf16, #tpu.memory_space<vmem>>, vector<32x128xbf16>
    tpu.vector_store %arg5[%c0_8, %c0_9], %14 {strides = array<i32>} : memref<32x128xbf16, #tpu.memory_space<vmem>>, vector<32x128xbf16>,
    return
  }
  func.func @transform_0(%arg0: i32, %arg1: i32) -> (i32, i32) {
    %c0_i32 = arith.constant 0 : i32
    %c0_i32_0 = arith.constant 0 : i32
    return %arg0, %c0_i32 : i32, i32
  }
  func.func @transform_1(%arg0: i32, %arg1: i32) -> (i32, i32) {
    %c0_i32 = arith.constant 0 : i32
    %c0_i32_0 = arith.constant 0 : i32
    return %c0_i32, %arg1 : i32, i32
  }
  func.func @transform_2(%arg0: i32, %arg1: i32) -> (i32, i32) {
    %c0_i32 = arith.constant 0 : i32
    %c0_i32_0 = arith.constant 0 : i32
    return %c0_i32, %arg1 : i32, i32
  }
  func.func @transform_3(%arg0: i32, %arg1: i32) -> (i32, i32) {
    %c0_i32 = arith.constant 0 : i32
    return %arg0, %arg1 : i32, i32
  }
}

module attributes {stable_mosaic.version = 11 : i64} {
  func.func @_linear_kernel(%arg0: i32, %arg1: i32, %arg2: memref<32x128xbf16, #tpu.memory_space<vmem>>, %arg3: memref<128x32xbf16, #tpu.memory_space<vmem>>, %arg4: memref<1x32xf32, #tpu.memory_space<vmem>>, %arg5: memref<32x32xf32, #tpu.memory_space<vmem>>) attributes {dimension_semantics = [#tpu.dimension_semantics<parallel>, #tpu.dimension_semantics<parallel>], iteration_bounds = array<i64: 1, 1>, scalar_prefetch = 0 : i64, scratch_operands = 0 : i64, tpu.core_type = #tpu.core_type<tc>, window_params = [{transform_indices = @transform_0, window_bounds = array<i64: 32, 128>}, {transform_indices = @transform_1, window_bounds = array<i64: 128, 32>}, {transform_indices = @transform_2, window_bounds = array<i64: 1, 32>}, {transform_indices = @transform_3, window_bounds = array<i64: 32, 32>}]} {
    %c0 = arith.constant 0 : index
    %c0_0 = arith.constant 0 : index
    %0 = vector.load %arg2[%c0, %c0_0] : memref<32x128xbf16, #tpu.memory_space<vmem>>, vector<32x128xbf16>
    %c0_1 = arith.constant 0 : index
    %c0_2 = arith.constant 0 : index
    %1 = vector.load %arg3[%c0_1, %c0_2] : memref<128x32xbf16, #tpu.memory_space<vmem>>, vector<128x32xbf16>
    %cst = arith.constant dense<0.000000e+00> : vector<32x32xf32>
    %2 = tpu.matmul %0, %1, %cst {dimension_numbers = #tpu.dot_dimension_numbers<[1], [0], [0], [1], [0, 0, 1, 1], [], []>} : vector<32x128xbf16>, vector<128x32xbf16>, vector<32x32xf32> -> vector<32x32xf32>
    %c0_3 = arith.constant 0 : index
    %c0_4 = arith.constant 0 : index
    %3 = vector.load %arg4[%c0_3, %c0_4] : memref<1x32xf32, #tpu.memory_space<vmem>>, vector<1x32xf32>
    %4 = vector.broadcast %3 : vector<1x32xf32> to vector<32x32xf32>
    %5 = arith.addf %2, %4 : vector<32x32xf32>
    %c0_5 = arith.constant 0 : index
    %c0_6 = arith.constant 0 : index
    %6 = vector.load %arg5[%c0_5, %c0_6] : memref<32x32xf32, #tpu.memory_space<vmem>>, vector<32x32xf32>
    tpu.vector_store %arg5[%c0_5, %c0_6], %5 {strides = array<i32>} : memref<32x32xf32, #tpu.memory_space<vmem>>, vector<32x32xf32>,
    return
  }
  func.func @transform_0(%arg0: i32, %arg1: i32) -> (i32, i32) {
    %c0_i32 = arith.constant 0 : i32
    %c0_i32_0 = arith.constant 0 : i32
    return %arg0, %c0_i32 : i32, i32
  }
  func.func @transform_1(%arg0: i32, %arg1: i32) -> (i32, i32) {
    %c0_i32 = arith.constant 0 : i32
    %c0_i32_0 = arith.constant 0 : i32
    return %c0_i32, %arg1 : i32, i32
  }
  func.func @transform_2(%arg0: i32, %arg1: i32) -> (i32, i32) {
    %c0_i32 = arith.constant 0 : i32
    %c0_i32_0 = arith.constant 0 : i32
    return %c0_i32, %arg1 : i32, i32
  }
  func.func @transform_3(%arg0: i32, %arg1: i32) -> (i32, i32) {
    %c0_i32 = arith.constant 0 : i32
    return %arg0, %arg1 : i32, i32
  }
}

</mosaic_0001>

<bundles_post_ra>
// kernel: reformer_forward.17
= control target key start
LH: loop header
LB: loop body
LE: loop exit
PB: predicated region body
PF: predicated region fallthrough
CT: control target
= control target key end

     0   :  { %vm52_vm0 = vcmask 261120   ;;  %vm124_vm1 = vcmask 257024   ;;  %s211_s1 = inlined_call_operand.vmem [shape: bf16[32,32], index: 1, kind: input, shape index: {}]   ;;  %s212_s0 = inlined_call_operand.vmem [shape: bf16[32,32], index: 0, kind: input, shape index: {}]   ;;  %s213_s2 = inlined_call_operand.vmem [shape: f32[1,32], index: 2, kind: input, shape index: {}]   ;;  %s214_s3 = inlined_call_operand.vmem [shape: bf16[32,32], index: 3, kind: output, shape index: {}]  }
   0x1   :  { %v160_v0 = vld [vmem:[%s211_s1 + $0x8] sm:$0xff]   ;;  %v161_v1 = vld [vmem:[%s211_s1] sm:$0xff]  }
   0x2   :  { %152 = vmatprep.subr.bf16.mxu0 %v160_v0  ;;  %v162_v2 = vld [vmem:[%s212_s0] sm:$0xff]   ;;  %v163_v3 = vld [vmem:[%s212_s0 + $0x8] sm:$0xff]  }
   0x3   :  { %153 = vmatpush3.bf16.msra.mxu0 %v160_v0  ;;  %156 = vmatprep.mubr.msk.bf16.mxu0 %vm52_vm0, %v162_v2  ;;  %v133_v4 = vld [vmem:[%s213_s2] ss:$0 sm:$0xff] }
   0x4   :  { %154 = vmatprep.subr.bf16.mxu0 %v161_v1 }
   0x7   :  { %155 = vmatpush3.bf16.msra.mxu0 %v161_v1 }
   0xa   :  { %157 = vmatmul.mubr.msk.bf16.vlgmr.msra.gmra.mxu0 %vm52_vm0, %v163_v3 }
  0xca   :  { %v158_v5 = vpop.f32.mrf.mxu0 }
  0xcb   :  { %v102_v6 = vadd.f32 %v158_v5, %v133_v4 }
  0xcc   :  { %v93_v7 = vpop.f32.mrf.mxu0 }
  0xcd   :  { %v146_v8 = vpack.c.bf16 %v102_v6, %v102_v6  ;;  %v94_v9 = vadd.f32 %v133_v4, %v93_v7 }
  0xce   :  { %v159_v10 = vpop.f32.mrf.mxu0 }
  0xcf   :  { %127 = vst.msk [vmem:[%s214_s3 + $0x8] sm:$0xf] %vm124_vm1, %v146_v8  ;;  %v144_v11 = vpack.c.bf16 %v94_v9, %v94_v9  ;;  %v105_v12 = vadd.f32 %v159_v10, %v133_v4 }
  0xd0   :  { %v96_v13 = vpop.f32.mrf.mxu0 }
  0xd1   :  { %125 = vst.msk [vmem:[%s214_s3] sm:$0xf] %vm124_vm1, %v144_v11  ;;  %v147_v14 = vpack.c.bf16 %v105_v12, %v105_v12  ;;  %v97_v15 = vadd.f32 %v133_v4, %v96_v13 }
  0xd3   :  { %128 = vst.msk [vmem:[%s214_s3 + $0xc] sm:$0xf] %vm124_vm1, %v147_v14  ;;  %v145_v16 = vpack.c.bf16 %v97_v15, %v97_v15 }
  0xd5   :  { %126 = vst.msk [vmem:[%s214_s3 + $0x4] sm:$0xf] %vm124_vm1, %v145_v16 }

// kernel: reformer_forward.16
= control target key start
LH: loop header
LB: loop body
LE: loop exit
PB: predicated region body
PF: predicated region fallthrough
CT: control target
= control target key end

     0   :  { %vm18_vm0 = vcmask 261120   ;;  %vm110_vm1 = vcmask 257024   ;;  %s199_s0 = inlined_call_operand.vmem [shape: f32[32,32], index: 0, kind: input, shape index: {}]   ;;  %s200_s1 = inlined_call_operand.vmem [shape: f32[1,32], index: 1, kind: input, shape index: {}]   ;;  %s201_s2 = inlined_call_operand.vmem [shape: f32[1,32], index: 2, kind: input, shape index: {}]   ;;  %s202_s3 = inlined_call_operand.vmem [shape: bf16[32,32], index: 3, kind: output, shape index: {}]  }
   0x1   :  { %v14_v0 = vld [vmem:[%s199_s0] sm:$0xff]  ;;  %v16_v1 = vld [vmem:[%s199_s0 + $0x10] sm:$0xff]  ;;  %v15_v2 = vld [vmem:[%s199_s0 + $0x8] sm:$0xff] }
   0x2   :  { %v19_v3 = vsel %vm18_vm0, %v14_v0, 0.0  ;;  %v25_v4 = vsel %vm18_vm0, %v16_v1, 0.0  ;;  %v17_v5 = vld [vmem:[%s199_s0 + $0x18] sm:$0xff]  ;;  %v22_v6 = vsel %vm18_vm0, %v15_v2, 0.0  ;;  %v119_v41 = vld [vmem:[%s200_s1] ss:$0 sm:$0xff] }
   0x3   :  { %20 = vadd.xlane.f32.xlu0 %v19_v3  ;;  %26 = vadd.xlane.f32.xlu1 %v25_v4  ;;  %v28_v7 = vsel %vm18_vm0, %v17_v5, 0.0  ;;  %v120_v43 = vld [vmem:[%s201_s2] ss:$0 sm:$0xff] }
   0x7   :  { %23 = vadd.xlane.f32.xlu0 %v22_v6  ;;  %29 = vadd.xlane.f32.xlu1 %v28_v7 }
  0x8c   :  { %v21_v8 = vpop.xlane.xlu0 %20  ;;  %v27_v9 = vpop.xlane.xlu1 %26 }
  0x8d   :  { %v32_v10 = vmul.f32 0.03125, %v21_v8  ;;  %v34_v11 = vmul.f32 0.03125, %v27_v9 }
  0x8f   :  { %v36_v12 = vsub.f32 %v14_v0, %v32_v10  ;;  %v38_v13 = vsub.f32 %v16_v1, %v34_v11 }
  0x90   :  { %v24_v14 = vpop.xlane.xlu0 %23  ;;  %v30_v15 = vpop.xlane.xlu1 %29 }
  0x91   :  { %v33_v16 = vmul.f32 0.03125, %v24_v14  ;;  %v35_v17 = vmul.f32 0.03125, %v30_v15  ;;  %v40_v18 = vmul.f32 %v36_v12, %v36_v12  ;;  %v42_v19 = vmul.f32 %v38_v13, %v38_v13 }
  0x93   :  { %v37_v20 = vsub.f32 %v15_v2, %v33_v16  ;;  %v39_v21 = vsub.f32 %v17_v5, %v35_v17  ;;  %v44_v22 = vsel %vm18_vm0, %v40_v18, 0.0  ;;  %v50_v23 = vsel %vm18_vm0, %v42_v19, 0.0 }
  0x94   :  { %45 = vadd.xlane.f32.xlu0 %v44_v22 }
  0x95   :  { %v41_v24 = vmul.f32 %v37_v20, %v37_v20  ;;  %v43_v25 = vmul.f32 %v39_v21, %v39_v21 }
  0x97   :  { %v47_v26 = vsel %vm18_vm0, %v41_v24, 0.0  ;;  %v53_v27 = vsel %vm18_vm0, %v43_v25, 0.0 }
  0x98   :  { %51 = vadd.xlane.f32.xlu0 %v50_v23  ;;  %48 = vadd.xlane.f32.xlu1 %v47_v26 }
  0x9c   :  { %54 = vadd.xlane.f32.xlu1 %v53_v27 }
 0x11d   :  { %v46_v28 = vpop.xlane.xlu0 %45 }
 0x11e   :  { %v56_v29 = vmul.f32 0.03125, %v46_v28 }
 0x120   :  { %v60_v30 = vadd.f32 1e-05, %v56_v29 }
 0x121   :  { %v49_v31 = vpop.xlane.xlu1 %48  ;;  %v52_v32 = vpop.xlane.xlu0 %51 }
 0x122   :  { %129 = vrsqrt.f32 %v60_v30  ;;  %v57_v33 = vmul.f32 0.03125, %v49_v31  ;;  %v58_v34 = vmul.f32 0.03125, %v52_v32 }
 0x124   :  { %v61_v35 = vadd.f32 1e-05, %v57_v33  ;;  %v62_v36 = vadd.f32 1e-05, %v58_v34 }
 0x125   :  { %v55_v37 = vpop.xlane.xlu1 %54 }
 0x126   :  { %131 = vrsqrt.f32 %v61_v35  ;;  %v59_v38 = vmul.f32 0.03125, %v55_v37 }
 0x127   :  { %133 = vrsqrt.f32 %v62_v36 }
 0x128   :  { %v63_v39 = vadd.f32 1e-05, %v59_v38 }
 0x12a   :  { %135 = vrsqrt.f32 %v63_v39 }
 0x12f   :  { %v130_v40 = vpop.eup %129 }
 0x130   :  { %v68_v42 = vmul.f32 %v130_v40, %v36_v12 }
 0x132   :  { %v79_v44 = vmul.f32 %v119_v41, %v68_v42 }
 0x133   :  { %v132_v45 = vpop.eup %131 }
 0x134   :  { %v134_v46 = vpop.eup %133  ;;  %v90_v47 = vadd.f32 %v120_v43, %v79_v44  ;;  %v69_v48 = vmul.f32 %v132_v45, %v37_v20 }
 0x135   :  { %v70_v49 = vmul.f32 %v134_v46, %v38_v13 }
 0x136   :  { %v125_v50 = vpack.c.bf16 %v90_v47, %v90_v47  ;;  %v80_v51 = vmul.f32 %v119_v41, %v69_v48 }
 0x137   :  { %v136_v52 = vpop.eup %135  ;;  %v81_v53 = vmul.f32 %v119_v41, %v70_v49 }
 0x138   :  { %111 = vst.msk [vmem:[%s202_s3] sm:$0xf] %vm110_vm1, %v125_v50  ;;  %v91_v54 = vadd.f32 %v120_v43, %v80_v51  ;;  %v71_v55 = vmul.f32 %v136_v52, %v39_v21 }
 0x139   :  { %v92_v56 = vadd.f32 %v120_v43, %v81_v53 }
 0x13a   :  { %v126_v57 = vpack.c.bf16 %v91_v54, %v91_v54  ;;  %v82_v58 = vmul.f32 %v119_v41, %v71_v55 }
 0x13b   :  { %v127_v59 = vpack.c.bf16 %v92_v56, %v92_v56 }
 0x13c   :  { %112 = vst.msk [vmem:[%s202_s3 + $0x4] sm:$0xf] %vm110_vm1, %v126_v57  ;;  %v93_v60 = vadd.f32 %v120_v43, %v82_v58 }
 0x13d   :  { %113 = vst.msk [vmem:[%s202_s3 + $0x8] sm:$0xf] %vm110_vm1, %v127_v59 }
 0x13e   :  { %v128_v61 = vpack.c.bf16 %v93_v60, %v93_v60 }
 0x140   :  { %114 = vst.msk [vmem:[%s202_s3 + $0xc] sm:$0xf] %vm110_vm1, %v128_v61 }

// kernel: reformer_forward.19
= control target key start
LH: loop header
LB: loop body
LE: loop exit
PB: predicated region body
PF: predicated region fallthrough
CT: control target
= control target key end

     0   :  { %s3811_s24 = smov 0   ;;  %s3813_s25 = smov 0   ;;  %s4657_s0 = inlined_call_operand.vmem [shape: bf16[8,8,4,8], index: 0, kind: input, shape index: {}, may-alias: {0,1}]   ;;  %s4658_s1 = inlined_call_operand.vmem [shape: bf16[8,8,4,8], index: 1, kind: input, shape index: {}, may-alias: {0,1}]   ;;  %s4659_s2 = inlined_call_operand.vmem [shape: bf16[8,8,4,8], index: 2, kind: input, shape index: {}, may-alias: {2,3}]   ;;  %s4660_s3 = inlined_call_operand.vmem [shape: bf16[8,8,4,8], index: 3, kind: input, shape index: {}, may-alias: {2,3}]   ;;  %s4661_s4 = inlined_call_operand.vmem [shape: s32[8,8,4,1], index: 4, kind: input, shape index: {}, may-alias: {4,5}]   ;;  %s4662_s5 = inlined_call_operand.vmem [shape: s32[8,8,4,1], index: 5, kind: input, shape index: {}, may-alias: {4,5}]   ;;  %s4663_s6 = inlined_call_operand.vmem [shape: bf16[8,8,4,8], index: 6, kind: output, shape index: {0}]   ;;  %s4664_s7 = inlined_call_operand.vmem [shape: f32[8,1,8,4], index: 7, kind: output, shape index: {1}]  }
   0x1   :  { %s3815_s26 = smov 0  }
   0x2 LB: > { %s30_s27 = sadd.s32 1, %s3761_s25  ;;  %p3294_p0 = scmp.ge.s32.totalorder %s3765_s26, 1  ;;  %s3765_s26 = sphi %s3815_s26, %s18_s26   ;;  %s3761_s25 = sphi %s3813_s25, %s4669_s25   ;;  %s3757_s24 = sphi %s3811_s24, %s4668_s24  }
   0x3   : > { %p32_p1 = scmp.ge.s32.totalorder %s30_s27, 8  ;;  %p510_p2 = scmp.lt.s32.totalorder %s3765_s26, 9 }
   0x5   : > { %s4671_s27 = smov (%p32_p1, %s30_s27), 0  ;;  %p511_p3 = pnand %p3294_p0, %p510_p2 }
   0x6   : > { %p642_p4 = scmp.lt.s32.totalorder (!%p511_p3), %s3757_s24, 7 }
   0x7   : > { %514 = sbr.rel (%p511_p3) target bundleno = 833 (0x341), region = 44 }
   0xc   : > { %v3767_v0 = vmov 0.0   ;;  %s4673_s24 = smov (!%p642_p4, %s3757_s24), 7  ;;  %vm4665_vm0 = vmmov 0   ;;  %v3769_v1 = vmov 0   ;;  %vm1081_vm1 = vcmask 64512  }
   0xd   : > { %3421 = vmatprep.subr.bf16.mxu0 %v3767_v0  ;;  %3427 = vmatprep.subr.bf16.mxu1 %v3767_v0  ;;  %s3838_s28 = sshll.u32 %s4673_s24, 4  ;;  %vm912_vm2 = vcmask 60416   ;;  %s3350_s13 = sshll.u32 %s4673_s24, 5  ;;  %v827_v56 = vlaneseq  ;;  %vm882_vm3 = vcmask 1042434   ;;  %vm884_vm4 = vcmask 1043459  }
   0xe   : > { %3423 = vmatprep.mubr.msk.bf16.mxu0 %vm4665_vm0, %v3767_v0  ;;  %3429 = vmatprep.mubr.msk.bf16.mxu1 %vm4665_vm0, %v3767_v0  ;;  %s3844_s8 = scalar_lea.vmem %s4657_s0, %s3838_s28  ;;  %s3346_s9 = sadd.s32 14, %s3838_s28  ;;  %vm886_vm5 = vcmask 1044484   ;;  %vm888_vm6 = vcmask 1045509   ;;  %vm890_vm7 = vcmask 1046534   ;;  %vm892_vm8 = vcmask 1047559  }
   0xf   : > { %3641 = vset.pattern.permute.xlu1 %v3769_v1  ;;  %3642 = vset.pattern.permute.xlu0 %v3769_v1  ;;  %v3848_v2 = vld [vmem:[%s3844_s8] sm:$0x3]  ;;  %v3851_v3 = vld [vmem:[%s3844_s8 + $0x2] sm:$0x3]  ;;  %v3854_v4 = vld [vmem:[%s3844_s8 + $0x4] sm:$0x3]  ;;  %s672_s12 = scalar_lea.vmem %s4658_s1, %s3346_s9  ;;  %s3965_s16 = scalar_lea.vmem %s4661_s4, %s3350_s13 }
  0x10   : > { %v3858_v5 = vsel %vm1081_vm1, %v3848_v2, 0  ;;  %v3862_v6 = vsel %vm1081_vm1, %v3851_v3, 0  ;;  %v898_v7 = vunpack.c.l.bf16 %v3854_v4  ;;  %v3866_v8 = vld [vmem:[%s3844_s8 + $0x6] sm:$0x3]  ;;  %v896_v10 = vunpack.c.l.bf16 %v3848_v2  ;;  %v3873_v11 = vld [vmem:[%s3844_s8 + $0xa] sm:$0x3]  ;;  %s718_s23 = scalar_lea.vmem %s4660_s3, %s3346_s9  ;;  %s4630_s14 = scalar_lea.vmem %s4663_s6, %s3838_s28 }
  0x11   : > { %3422 = vmatpush3.bf16.xpose.msra.mxu0 %v3858_v5  ;;  %3428 = vmatpush3.bf16.xpose.msra.mxu1 %v3862_v6  ;;  %v899_v9 = vunpack.c.l.bf16 %v3866_v8  ;;  %v897_v12 = vunpack.c.l.bf16 %v3851_v3  ;;  %v901_v16 = vunpack.c.l.bf16 %v3873_v11  ;;  %v3886_v18 = vld [vmem:[%s3844_s8 + $0x8] sm:$0x3]  ;;  %v805_v19 = vld [vmem:[%s672_s12] sm:$0x3]  ;;  %v3891_v22 = vsel %vm1081_vm1, %v3854_v4, 0  ;;  %s3352_s17 = sadd.s32 28, %s3350_s13 }
  0x12   : > { %v906_v13 = vmul.f32 %v898_v7, %v898_v7  ;;  %3433 = vmatprep.subr.bf16.mxu0 %v3767_v0  ;;  %3439 = vmatprep.subr.bf16.mxu1 %v3767_v0  ;;  %v904_v15 = vmul.f32 %v896_v10, %v896_v10  ;;  %v3895_v23 = vsel %vm1081_vm1, %v3866_v8, 0  ;;  %v937_v26 = vunpack.c.l.bf16 %v805_v19  ;;  %v3904_v28 = vld [vmem:[%s3844_s8 + $0xc] sm:$0x3]  ;;  %v3932_v39 = vld [vmem:[%s3844_s8 + $0xe] sm:$0x3]  ;;  %s764_s20 = scalar_lea.vmem %s4662_s5, %s3352_s17  ;;  %s695_s8 = scalar_lea.vmem %s4659_s2, %s3838_s28 }
  0x13   : > { %v907_v14 = vmul.f32 %v899_v9, %v899_v9  ;;  %v905_v21 = vmul.f32 %v897_v12, %v897_v12  ;;  %v909_v25 = vmul.f32 %v901_v16, %v901_v16  ;;  %v900_v27 = vunpack.c.l.bf16 %v3886_v18  ;;  %v815_v47 = vld [vmem:[%s3965_s16] sm:$0xf]  ;;  %v817_v48 = vld [vmem:[%s3965_s16 + $0x8] sm:$0xf]  ;;  %v818_v49 = vld [vmem:[%s3965_s16 + $0xc] sm:$0xf] }
  0x14   : > { %v919_v17 = vsel %vm912_vm2, %v906_v13, 0.0  ;;  %v913_v20 = vsel %vm912_vm2, %v904_v15, 0.0  ;;  %v938_v31 = vmul.f32 %v937_v26, %v937_v26  ;;  %v902_v33 = vunpack.c.l.bf16 %v3904_v28  ;;  %v819_v50 = vld [vmem:[%s3965_s16 + $0x10] sm:$0xf]  ;;  %v820_v51 = vld [vmem:[%s3965_s16 + $0x14] sm:$0xf] }
  0x15   : > { %920 = vadd.xlane.f32.xlu1 %v919_v17  ;;  %914 = vadd.xlane.f32.xlu0 %v913_v20  ;;  %v922_v24 = vsel %vm912_vm2, %v907_v14, 0.0  ;;  %v916_v29 = vsel %vm912_vm2, %v905_v21, 0.0  ;;  %v928_v30 = vsel %vm912_vm2, %v909_v25, 0.0  ;;  %v908_v32 = vmul.f32 %v900_v27, %v900_v27  ;;  %v816_v52 = vld [vmem:[%s3965_s16 + $0x4] sm:$0xf]  ;;  %s3309_s9 = sshll.u32 %s4673_s24, 3 }
  0x16   : > { %v3919_v34 = vsel %vm1081_vm1, %v3886_v18, 0  ;;  %v3923_v35 = vsel %vm1081_vm1, %v3873_v11, 0  ;;  %v939_v36 = vsel %vm912_vm2, %v938_v31, 0.0  ;;  %v910_v38 = vmul.f32 %v902_v33, %v902_v33  ;;  %v821_v53 = vld [vmem:[%s3965_s16 + $0x18] sm:$0xf]  ;;  %s795_s12 = scalar_lea.vmem %s4664_s7, %s3309_s9 }
  0x17   : > { %v925_v37 = vsel %vm912_vm2, %v908_v32, 0.0  ;;  %v903_v40 = vunpack.c.l.bf16 %v3932_v39  ;;  %v1341_v43 = vsel %vm1081_vm1, %v3904_v28, 0  ;;  %v1384_v44 = vsel %vm1081_vm1, %v3932_v39, 0  ;;  %v823_v54 = vld [vmem:[%s764_s20] sm:$0xf] }
  0x18   : > { %3424 = vmatmul.mubr.msk.bf16.vlgmr.msra.gmra.mxu0 %vm1081_vm1, %v3848_v2  ;;  %3430 = vmatmul.mubr.msk.bf16.vlgmr.msra.gmra.mxu1 %vm1081_vm1, %v3851_v3  ;;  %v931_v41 = vsel %vm912_vm2, %v910_v38, 0.0  ;;  %v1500_v46 = vsel %vm1081_vm1, %v805_v19, 0  ;;  %v822_v55 = vld [vmem:[%s3965_s16 + $0x1c] sm:$0xf]  ;;  %v828_v57 = vand.u32 127, %v827_v56  ;;  %v4035_v58 = vshrl.u32 %v827_v56, 7 }
  0x19   : > { %3434 = vmatpush3.bf16.xpose.msra.mxu0 %v3891_v22  ;;  %3440 = vmatpush3.bf16.xpose.msra.mxu1 %v3895_v23  ;;  %v911_v42 = vmul.f32 %v903_v40, %v903_v40  ;;  %vm894_vm9 = vcmask 1040384  }
  0x1a   : > { %923 = vadd.xlane.f32.xlu1 %v922_v24  ;;  %3435 = vmatprep.mubr.msk.bf16.mxu0 %vm4665_vm0, %v3767_v0  ;;  %v4040_v61 = vsub.s32 %v828_v57, %v4035_v58 }
  0x1b   : > { %3441 = vmatprep.mubr.msk.bf16.mxu1 %vm4665_vm0, %v3767_v0  ;;  %3445 = vmatprep.subr.bf16.mxu0 %v3767_v0  ;;  %v934_v45 = vsel %vm912_vm2, %v911_v42, 0.0 }
  0x1c   : > { %3451 = vmatprep.subr.bf16.mxu1 %v3767_v0  ;;  %917 = vadd.xlane.f32.xlu0 %v916_v29 }
  0x1e   : > { %929 = vadd.xlane.f32.xlu1 %v928_v30 }
  0x20   : > { %3436 = vmatmul.mubr.msk.bf16.vlgmr.msra.gmra.mxu0 %vm1081_vm1, %v3854_v4  ;;  %3442 = vmatmul.mubr.msk.bf16.vlgmr.msra.gmra.mxu1 %vm1081_vm1, %v3866_v8 }
  0x21   : > { %3446 = vmatpush3.bf16.xpose.msra.mxu0 %v3919_v34  ;;  %3452 = vmatpush3.bf16.xpose.msra.mxu1 %v3923_v35 }
  0x22   : > { %940 = vadd.xlane.f32.xlu1 %v939_v36  ;;  %926 = vadd.xlane.f32.xlu0 %v925_v37 }
  0x23   : > { %3447 = vmatprep.mubr.msk.bf16.mxu0 %vm4665_vm0, %v3767_v0  ;;  %3453 = vmatprep.mubr.msk.bf16.mxu1 %vm4665_vm0, %v3767_v0 }
  0x24   : > { %3457 = vmatprep.subr.bf16.mxu0 %v3767_v0  ;;  %3463 = vmatprep.subr.bf16.mxu1 %v3767_v0 }
  0x26   : > { %932 = vadd.xlane.f32.xlu0 %v931_v41 }
  0x28   : > { %3448 = vmatmul.mubr.msk.bf16.vlgmr.msra.gmra.mxu0 %vm1081_vm1, %v3886_v18  ;;  %3454 = vmatmul.mubr.msk.bf16.vlgmr.msra.gmra.mxu1 %vm1081_vm1, %v3873_v11 }
  0x29   : > { %3458 = vmatpush3.bf16.xpose.msra.mxu0 %v1341_v43  ;;  %3464 = vmatpush3.bf16.xpose.msra.mxu1 %v1384_v44 }
  0x2a   : > { %3459 = vmatprep.mubr.msk.bf16.mxu0 %vm4665_vm0, %v3767_v0  ;;  %3465 = vmatprep.mubr.msk.bf16.mxu1 %vm4665_vm0, %v3767_v0 }
  0x2b   : > { %3469 = vmatprep.subr.bf16.mxu0 %v3767_v0  ;;  %3475 = vmatprep.subr.bf16.mxu1 %v3767_v0 }
  0x2c   : > { %935 = vadd.xlane.f32.xlu0 %v934_v45 }
  0x30   : > { %3460 = vmatmul.mubr.msk.bf16.vlgmr.msra.gmra.mxu0 %vm1081_vm1, %v3904_v28  ;;  %3466 = vmatmul.mubr.msk.bf16.vlgmr.msra.gmra.mxu1 %vm1081_vm1, %v3932_v39 }
  0x31   : > { %3470 = vmatpush3.bf16.xpose.msra.mxu0 %v1500_v46  ;;  %3476 = vmatpush3.bf16.xpose.msra.mxu1 %v3858_v5 }
  0x32   : > { %3471 = vmatprep.mubr.msk.bf16.mxu0 %vm4665_vm0, %v3767_v0  ;;  %3477 = vmatprep.mubr.msk.bf16.mxu1 %vm4665_vm0, %v3767_v0 }
  0x33   : > { %834 = vperm.xlu1 %3641, %v815_v47   ;;  %3481 = vmatprep.subr.bf16.mxu0 %v3767_v0 }
  0x34   : > { %3487 = vmatprep.subr.bf16.mxu1 %v3767_v0 }
  0x37   : > { %840 = vperm.xlu1 %3641, %v817_v48  }
  0x38   : > { %3472 = vmatmul.mubr.msk.bf16.vlgmr.msra.gmra.mxu0 %vm1081_vm1, %v3848_v2  ;;  %3478 = vmatmul.mubr.msk.bf16.vlgmr.msra.gmra.mxu1 %vm1081_vm1, %v3851_v3 }
  0x39   : > { %3482 = vmatpush3.bf16.xpose.msra.mxu0 %v3862_v6  ;;  %3488 = vmatpush3.bf16.xpose.msra.mxu1 %v3891_v22 }
  0x3a   : > { %3483 = vmatprep.mubr.msk.bf16.mxu0 %vm4665_vm0, %v3767_v0  ;;  %3489 = vmatprep.mubr.msk.bf16.mxu1 %vm4665_vm0, %v3767_v0 }
  0x3b   : > { %843 = vperm.xlu1 %3641, %v818_v49   ;;  %3493 = vmatprep.subr.bf16.mxu0 %v3767_v0 }
  0x3c   : > { %3499 = vmatprep.subr.bf16.mxu1 %v3767_v0 }
  0x3f   : > { %846 = vperm.xlu1 %3641, %v819_v50  }
  0x40   : > { %3484 = vmatmul.mubr.msk.bf16.vlgmr.msra.gmra.mxu0 %vm1081_vm1, %v3854_v4  ;;  %3490 = vmatmul.mubr.msk.bf16.vlgmr.msra.gmra.mxu1 %vm1081_vm1, %v3866_v8 }
  0x41   : > { %3494 = vmatpush3.bf16.xpose.msra.mxu0 %v3895_v23  ;;  %3500 = vmatpush3.bf16.xpose.msra.mxu1 %v3919_v34 }
  0x42   : > { %3495 = vmatprep.mubr.msk.bf16.mxu0 %vm4665_vm0, %v3767_v0  ;;  %3501 = vmatprep.mubr.msk.bf16.mxu1 %vm4665_vm0, %v3767_v0 }
  0x43   : > { %849 = vperm.xlu1 %3641, %v820_v51   ;;  %837 = vperm.xlu0 %3642, %v816_v52  }
  0x44   : > { %3505 = vmatprep.subr.bf16.mxu0 %v3767_v0  ;;  %3511 = vmatprep.subr.bf16.mxu1 %v3767_v0 }
  0x47   : > { %852 = vperm.xlu1 %3641, %v821_v53  }
  0x48   : > { %3496 = vmatmul.mubr.msk.bf16.vlgmr.msra.gmra.mxu0 %vm1081_vm1, %v3886_v18  ;;  %3502 = vmatmul.mubr.msk.bf16.vlgmr.msra.gmra.mxu1 %vm1081_vm1, %v3873_v11 }
  0x49   : > { %3506 = vmatpush3.bf16.xpose.msra.mxu0 %v3923_v35  ;;  %3512 = vmatpush3.bf16.xpose.msra.mxu1 %v1341_v43 }
  0x4a   : > { %3507 = vmatprep.mubr.msk.bf16.mxu0 %vm4665_vm0, %v3767_v0  ;;  %3513 = vmatprep.mubr.msk.bf16.mxu1 %vm4665_vm0, %v3767_v0 }
  0x4b   : > { %825 = vperm.xlu1 %3641, %v823_v54   ;;  %3517 = vmatprep.subr.bf16.mxu0 %v3767_v0 }
  0x4c   : > { %3523 = vmatprep.subr.bf16.mxu1 %v3767_v0 }
  0x4f   : > { %1921 = vperm.xlu1 %3641, %v822_v55  }
  0x50   : > { %3508 = vmatmul.mubr.msk.bf16.vlgmr.msra.gmra.mxu0 %vm1081_vm1, %v3904_v28  ;;  %3514 = vmatmul.mubr.msk.bf16.vlgmr.msra.gmra.mxu1 %vm1081_vm1, %v3932_v39  ;;  %vm2056_vm1 = vcmask 27648  }
  0x51   : > { %3519 = vmatprep.mubr.msk.bf16.mxu0 %vm4665_vm0, %v3767_v0  ;;  %3525 = vmatprep.mubr.msk.bf16.mxu1 %vm4665_vm0, %v3767_v0 }
  0x9e   : > { %v4037_v59 = vpop.xlane.xlu1 %920  ;;  %v915_v60 = vpop.xlane.xlu0 %914 }
  0x9f   : > { %v958_v62 = vrot.slane %v915_v60, %v4040_v61  ;;  %3643 = vrsqrt.f32 %v915_v60  ;;  %v966_v63 = vrot.slane %v4037_v59, %v4040_v61  ;;  %vm993_vm10 = vcmp.eq.f32.partialorder %v915_v60, inf }
  0xa0   : > { %v996_v24 = vand.u32 2147483648, %v915_v60  ;;  %vm995_vm12 = vcmp.eq.f32.partialorder %v915_v60, 0.0  ;;  %vm1007_vm2 = vcmp.eq.f32.partialorder %v4037_v59, inf  ;;  %v1010_v55 = vand.u32 2147483648, %v4037_v59 }
  0xa3   : > { %v4045_v1 = vpop.xlane.xlu1 %923 }
  0xa4   : > { %v970_v4 = vrot.slane %v4045_v1, %v4040_v61  ;;  %v1017_v56 = vand.u32 2147483648, %v4045_v1 }
  0xa5   : > { %v918_v2 = vpop.xlane.xlu0 %917 }
  0xa6   : > { %v962_v3 = vrot.slane %v918_v2, %v4040_v61  ;;  %3645 = vrsqrt.f32 %v918_v2  ;;  %vm1000_vm11 = vcmp.eq.f32.partialorder %v918_v2, inf  ;;  %v1003_v26 = vand.u32 2147483648, %v918_v2 }
  0xa7   : > { %v4052_v7 = vpop.xlane.xlu1 %929  ;;  %vm1002_vm13 = vcmp.eq.f32.partialorder %v918_v2, 0.0 }
  0xa8   : > { %v983_v5 = vsel %vm882_vm3, %v962_v3, %v958_v62  ;;  %v978_v10 = vrot.slane %v4052_v7, %v4040_v61 }
  0xa9   : > { %v984_v6 = vsel %vm884_vm4, %v966_v63, %v983_v5 }
  0xaa   : > { %v985_v9 = vsel %vm886_vm5, %v970_v4, %v984_v6 }
  0xab   : > { %v4054_v8 = vpop.xlane.xlu0 %926  ;;  %v941_v17 = vpop.xlane.xlu1 %940 }
  0xac   : > { %v974_v11 = vrot.slane %v4054_v8, %v4040_v61  ;;  %v3644_v16 = vpop.eup %3643  ;;  %v946_v18 = vrot.slane %v941_v17, %v4040_v61  ;;  %vm1021_vm0 = vcmp.eq.f32.partialorder %v4054_v8, inf  ;;  %v1031_v17 = vand.u32 2147483648, %v4052_v7 }
  0xad   : > { %v992_v21 = vmul.f32 %v3644_v16, %v915_v60 }
  0xae   : > { %v986_v12 = vsel %vm888_vm6, %v974_v11, %v985_v9 }
  0xaf   : > { %v4062_v13 = vpop.xlane.xlu0 %932  ;;  %v987_v15 = vsel %vm890_vm7, %v978_v10, %v986_v12  ;;  %v994_v25 = vsel %vm993_vm10, %v915_v60, %v992_v21  ;;  %v4070_v31 = vpop.permute.xlu1 %834  ;;  %vm1014_vm10 = vcmp.eq.f32.partialorder %v4045_v1, inf }
  0xb0   : > { %v982_v14 = vrot.slane %v4062_v13, %v4040_v61  ;;  %v997_v28 = vsel %vm995_vm12, %v996_v24, %v994_v25  ;;  %v857_v52 = vrot.slane %v4070_v31, %v4040_v61  ;;  %vm1016_vm12 = vcmp.eq.f32.partialorder %v4045_v1, 0.0 }
  0xb1   : > { %v1047_v30 = vadd.f32 1e-06, %v997_v28 }
  0xb2   : > { %v988_v20 = vsel %vm892_vm8, %v982_v14, %v987_v15 }
  0xb3   : > { %v3646_v19 = vpop.eup %3645  ;;  %v990_v23 = vsel %vm894_vm9, %v946_v18, %v988_v20  ;;  %v4074_v33 = vpop.permute.xlu1 %840 }
  0xb4   : > { %v999_v22 = vmul.f32 %v3646_v19, %v918_v2  ;;  %3647 = vrsqrt.f32 %v990_v23  ;;  %vm1073_vm14 = vcmp.eq.f32.partialorder %v990_v23, inf  ;;  %v1076_v38 = vand.u32 2147483648, %v990_v23 }
  0xb5   : > { %3649 = vrsqrt.f32 %v4037_v59  ;;  %v4080_v37 = vpop.xlane.xlu0 %935  ;;  %vm1075_vm15 = vcmp.eq.f32.partialorder %v990_v23, 0.0 }
  0xb6   : > { %v1001_v27 = vsel %vm1000_vm11, %v918_v2, %v999_v22  ;;  %3651 = vrcp.f32 %v1047_v30  ;;  %vm1009_vm11 = vcmp.eq.f32.partialorder %v4037_v59, 0.0  ;;  %v4107_v2 = vrot.slane %v4074_v33, %v4040_v61 }
  0xb7   : > { %v1004_v29 = vsel %vm1002_vm13, %v1003_v26, %v1001_v27  ;;  %v4078_v36 = vpop.permute.xlu1 %843  ;;  %vm1028_vm13 = vcmp.eq.f32.partialorder %v4052_v7, inf }
  0xb8   : > { %v1048_v32 = vadd.f32 1e-06, %v1004_v29  ;;  %v4124_v18 = vrot.slane %v4078_v36, %v4040_v61  ;;  %v3770_v29 = vmov 1966171168  }
  0xb9   : > { %v1825_v30 = vunpack.c.l.s4 %v3770_v29 }
  0xba   : > { %3653 = vrcp.f32 %v1048_v32 }
  0xbb   : > { %3655 = vrsqrt.f32 %v4045_v1  ;;  %v4082_v45 = vpop.permute.xlu1 %846 }
  0xbc   : > { %3657 = vrsqrt.f32 %v4052_v7 }
  0xbd   : > { %3659 = vrsqrt.f32 %v4054_v8 }
  0xbe   : > { %v4084_v46 = vpop.permute.xlu0 %837  ;;  %3661 = vrsqrt.f32 %v4080_v37 }
  0xbf   : > { %3663 = vrsqrt.f32 %v4062_v13  ;;  %v861_v53 = vrot.slane %v4084_v46, %v4040_v61  ;;  %v4100_v60 = vpop.permute.xlu1 %849 }
  0xc1   : > { %v3648_v34 = vpop.eup %3647  ;;  %v883_v9 = vsel %vm882_vm3, %v861_v53, %v857_v52 }
  0xc2   : > { %v1072_v35 = vmul.f32 %v3648_v34, %v990_v23  ;;  %v3650_v40 = vpop.eup %3649  ;;  %v885_v22 = vsel %vm884_vm4, %v4107_v2, %v883_v9  ;;  %v4149_v34 = vrot.slane %v4082_v45, %v4040_v61 }
  0xc3   : > { %v3652_v41 = vpop.eup %3651  ;;  %v1006_v50 = vmul.f32 %v3650_v40, %v4037_v59  ;;  %v4140_v28 = vpop.permute.xlu1 %852  ;;  %v887_v40 = vsel %vm886_vm5, %v4124_v18, %v885_v22 }
  0xc4   : > { %v1074_v39 = vsel %vm1073_vm14, %v990_v23, %v1072_v35  ;;  %v1056_v47 = vmul.f32 0.35355338, %v3652_v41  ;;  %vm1944_vm14 = vcmp.eq.s32.totalorder %v4084_v46, %v861_v53 }
  0xc5   : > { %v1077_v43 = vsel %vm1075_vm15, %v1076_v38, %v1074_v39  ;;  %v1008_v5 = vsel %vm1007_vm2, %v4037_v59, %v1006_v50  ;;  %vm1943_vm15 = vcmp.eq.s32.totalorder %v4070_v31, %v857_v52  ;;  %v1024_v59 = vand.u32 2147483648, %v4054_v8 }
  0xc6   : > { %v1078_v49 = vadd.f32 1e-06, %v1077_v43  ;;  %v1437_v62 = vrot.slane %v1056_v47, %v4040_v61  ;;  %v1011_v21 = vsel %vm1009_vm11, %v1010_v55, %v1008_v5  ;;  %vm1030_vm2 = vcmp.eq.f32.partialorder %v4052_v7, 0.0 }
  0xc7   : > { %v3654_v42 = vpop.eup %3653  ;;  %v1049_v38 = vadd.f32 1e-06, %v1011_v21  ;;  %v1826_v50 = vunpack.c.0.s8 %v1825_v30  ;;  %vm1035_vm11 = vcmp.eq.f32.partialorder %v4062_v13, inf }
  0xc8   : > { %v3656_v44 = vpop.eup %3655  ;;  %v1058_v48 = vmul.f32 0.35355338, %v3654_v42  ;;  %3665 = vrcp.f32 %v1078_v49 }
  0xc9   : > { %v1013_v51 = vmul.f32 %v3656_v44, %v4045_v1  ;;  %v3658_v54 = vpop.eup %3657  ;;  %3667 = vrcp.f32 %v1049_v38  ;;  %v4179_v9 = vsub.s32 %v1826_v50, %v4035_v58 }
  0xca   : > { %v3660_v57 = vpop.eup %3659  ;;  %v1441_v63 = vrot.slane %v1058_v48, %v4040_v61  ;;  %v1027_v12 = vmul.f32 %v3658_v54, %v4052_v7  ;;  %v4163_v48 = vrot.slane %v4100_v60, %v4040_v61  ;;  %v826_v54 = vpop.permute.xlu1 %825 }
  0xcb   : > { %v1015_v6 = vsel %vm1014_vm10, %v4045_v1, %v1013_v51  ;;  %v1020_v16 = vmul.f32 %v3660_v57, %v4054_v8  ;;  %vm1023_vm10 = vcmp.eq.f32.partialorder %v4054_v8, 0.0  ;;  %v3662_v42 = vpop.eup %3661  ;;  %v4171_v57 = vrot.slane %v4140_v28, %v4040_v61 }
  0xcc   : > { %v1018_v27 = vsel %vm1016_vm12, %v1017_v56, %v1015_v6  ;;  %v1029_v32 = vsel %vm1028_vm13, %v4052_v7, %v1027_v12  ;;  %v3664_v47 = vpop.eup %3663  ;;  %v1041_v53 = vmul.f32 %v3662_v42, %v4080_v37  ;;  %v1045_v6 = vand.u32 2147483648, %v4080_v37 }
  0xcd   : > { %v1022_v39 = vsel %vm1021_vm0, %v4054_v8, %v1020_v16  ;;  %v1050_v41 = vadd.f32 1e-06, %v1018_v27  ;;  %v1032_v44 = vsel %vm1030_vm2, %v1031_v17, %v1029_v32  ;;  %v889_v8 = vsel %vm888_vm6, %v4149_v34, %v887_v40 }
  0xce   : > { %v1025_v49 = vsel %vm1023_vm10, %v1024_v59, %v1022_v39  ;;  %v1052_v55 = vadd.f32 1e-06, %v1032_v44  ;;  %vm1042_vm0 = vcmp.eq.f32.partialorder %v4080_v37, inf  ;;  %v891_v5 = vsel %vm890_vm7, %v4163_v48, %v889_v8 }
  0xcf   : > { %3669 = vrcp.f32 %v1050_v41  ;;  %v1038_v12 = vand.u32 2147483648, %v4062_v13  ;;  %vm1044_vm12 = vcmp.eq.f32.partialorder %v4080_v37, 0.0  ;;  %v893_v17 = vsel %vm892_vm8, %v4171_v57, %v891_v5 }
  0xd0   : > { %3671 = vrcp.f32 %v1052_v55  ;;  %vm1037_vm13 = vcmp.eq.f32.partialorder %v4062_v13, 0.0  ;;  %vm1946_vm2 = vcmp.eq.s32.totalorder %v4078_v36, %v4124_v18  ;;  %vm1947_vm10 = vcmp.eq.s32.totalorder %v4082_v45, %v4149_v34 }
  0xd5   : > { %v3666_v56 = vpop.eup %3665 }
  0xd6   : > { %v4187_v16 = vmul.f32 0.35355338, %v3666_v56  ;;  %v3668_v40 = vpop.eup %3667 }
  0xd8   : > { %v1119_v3 = vpop.f32.mrf.mxu0  ;;  %v1162_v4 = vpop.f32.mrf.mxu1  ;;  %v1830_v29 = vrot.slane %v4187_v16, %v4179_v9 }
  0xd9   : > { %v1491_v10 = vmul.f32 %v1437_v62, %v1119_v3  ;;  %v1492_v11 = vmul.f32 %v1441_v63, %v1162_v4  ;;  %v1051_v3 = vadd.f32 1e-06, %v1025_v49  ;;  %v1034_v4 = vmul.f32 %v3664_v47, %v4062_v13 }
  0xda   : > { %v3425_v14 = vpop.f32.mrf.mxu0  ;;  %v3431_v15 = vpop.f32.mrf.mxu1  ;;  %v1838_v41 = vcombine.high %v1830_v29, %v1830_v29  ;;  %v4206_v49 = vsub.s32 0, %v4035_v58 }
  0xdb   : > { %v4126_v19 = vsel %vm1943_vm15, -100000.0, %v1491_v10  ;;  %v4128_v20 = vsel %vm1944_vm14, -100000.0, %v1492_v11  ;;  %v832_v14 = vrot.slane %v826_v54, %v4040_v61  ;;  %v1043_v15 = vsel %vm1042_vm0, %v4080_v37, %v1041_v53 }
  0xdc   : > { %v1122_v23 = vpop.f32.mrf.mxu0  ;;  %v1165_v24 = vpop.f32.mrf.mxu1  ;;  %v2057_v25 = vsel %vm2056_vm1, %v4126_v19, -inf  ;;  %v2060_v26 = vsel %vm2056_vm1, %v4128_v20, -inf  ;;  %3673 = vrcp.f32 %v1051_v3  ;;  %v1846_v53 = vrot.slane %v1830_v29, %v4179_v9 }
  0xdd   : > { %2058 = vmax.xlane.f32.xlu1 %v2057_v25  ;;  %2061 = vmax.xlane.f32.xlu0 %v2060_v26  ;;  %v1036_v23 = vsel %vm1035_vm11, %v4062_v13, %v1034_v4  ;;  %v1046_v26 = vsel %vm1044_vm12, %v1045_v6, %v1043_v15  ;;  %v895_v27 = vsel %vm894_vm9, %v832_v14, %v893_v17  ;;  %v3670_v13 = vpop.eup %3669 }
  0xde   : > { %v3426_v1 = vpop.f32.mrf.mxu0  ;;  %v3432_v35 = vpop.f32.mrf.mxu1  ;;  %v1039_v37 = vsel %vm1037_vm13, %v1038_v12, %v1036_v23  ;;  %v1966_v30 = vrot.slane %v895_v27, %v4179_v9  ;;  %v1860_v54 = vrot.slane %v1838_v41, %v4179_v9  ;;  %vm1945_vm9 = vcmp.eq.s32.totalorder %v4074_v33, %v4107_v2 }
  0xdf   : > { %v1054_v1 = vadd.f32 1e-06, %v1046_v26  ;;  %v1053_v39 = vadd.f32 1e-06, %v1039_v37  ;;  %v3672_v55 = vpop.eup %3671  ;;  %v1875_v15 = vrot.slane %v1846_v53, %v4206_v49  ;;  %v1959_v23 = vcombine.high %v895_v27, %v895_v27 }
  0xe0   : > { %v4157_v43 = vpop.f32.mrf.mxu0  ;;  %v4159_v7 = vpop.f32.mrf.mxu1  ;;  %v1974_v42 = vcombine.high %v1966_v30, %v1966_v30  ;;  %v1879_v17 = vrot.slane %v1860_v54, %v4206_v49  ;;  %v1868_v41 = vcombine.high %v1846_v53, %v1846_v53  ;;  %vm1948_vm12 = vcmp.eq.s32.totalorder %v4100_v60, %v4163_v48 }
  0xe1   : > { %3675 = vrcp.f32 %v1054_v1 }
  0xe2   : > { %v3437_v51 = vpop.f32.mrf.mxu0  ;;  %v3443_v52 = vpop.f32.mrf.mxu1  ;;  %3677 = vrcp.f32 %v1053_v39  ;;  %v1996_v3 = vrot.slane %v1974_v42, %v4179_v9  ;;  %v1883_v2 = vrot.slane %v1868_v41, %v4206_v49 }
  0xe3   : > { %v1060_v51 = vmul.f32 0.35355338, %v3668_v40  ;;  %v1062_v52 = vmul.f32 0.35355338, %v3670_v13  ;;  %v1870_v13 = vcombine.high %v1860_v54, %v1860_v54 }
  0xe4   : > { %v1208_v62 = vpop.f32.mrf.mxu0  ;;  %v1251_v63 = vpop.f32.mrf.mxu1 }
  0xe5   : > { %v1982_v63 = vrot.slane %v1966_v30, %v4179_v9  ;;  %v1445_v12 = vrot.slane %v1060_v51, %v4040_v61  ;;  %v1449_v14 = vrot.slane %v1062_v52, %v4040_v61 }
  0xe6   : > { %v3438_v10 = vpop.f32.mrf.mxu0  ;;  %v3444_v11 = vpop.f32.mrf.mxu1 }
  0xe7   : > { %v2011_v6 = vrot.slane %v1982_v63, %v4206_v49  ;;  %v2015_v10 = vrot.slane %v1996_v3, %v4206_v49  ;;  %v1823_v11 = vcombine.high %v4187_v16, %v4187_v16  ;;  %v2004_v29 = vcombine.high %v1982_v63, %v1982_v63 }
  0xe8   : > { %v4191_v21 = vpop.f32.mrf.mxu0  ;;  %v4193_v22 = vpop.f32.mrf.mxu1  ;;  %v1493_v30 = vmul.f32 %v1445_v12, %v4157_v43  ;;  %v1973_v43 = vrot.slane %v1959_v23, %v4179_v9  ;;  %v1887_v63 = vrot.slane %v1870_v13, %v4206_v49 }
  0xe9   : > { %v3674_v4 = vpop.eup %3673  ;;  %vm2040_vm14 = vcmp.eq.s32.totalorder %v4070_v31, %v2011_v6  ;;  %vm2041_vm15 = vcmp.eq.s32.totalorder %v4084_v46, %v2015_v10  ;;  %v1837_v27 = vrot.slane %v1823_v11, %v4179_v9 }
  0xea   : > { %v3449_v24 = vpop.f32.mrf.mxu0  ;;  %v3455_v25 = vpop.f32.mrf.mxu1  ;;  %v4241_v46 = vsel %vm1945_vm9, -100000.0, %v1493_v30  ;;  %v1975_v11 = vcombine.high %v1973_v43, %v1973_v43 }
  0xeb   : > { %v1064_v24 = vmul.f32 0.35355338, %v3674_v4  ;;  %v1066_v25 = vmul.f32 0.35355338, %v3672_v55  ;;  %v2019_v55 = vrot.slane %v2004_v29, %v4206_v49  ;;  %v2063_v6 = vsel %vm2056_vm1, %v4241_v46, -inf }
  0xec   : > { %v1294_v59 = vpop.f32.mrf.mxu0  ;;  %v1337_v32 = vpop.f32.mrf.mxu1 }
  0xed   : > { %v1494_v59 = vmul.f32 %v1449_v14, %v4159_v7  ;;  %v1453_v52 = vrot.slane %v1064_v24, %v4040_v61  ;;  %vm2042_vm0 = vcmp.eq.s32.totalorder %v4074_v33, %v2019_v55 }
  0xee   : > { %v3450_v35 = vpop.f32.mrf.mxu0  ;;  %v3456_v38 = vpop.f32.mrf.mxu1 }
  0xef   : > { %v2006_v38 = vcombine.high %v1996_v3, %v1996_v3  ;;  %v3676_v51 = vpop.eup %3675  ;;  %v1839_v3 = vcombine.high %v1837_v27, %v1837_v27  ;;  %v1495_v4 = vmul.f32 %v1453_v52, %v4191_v21 }
  0xf0   : > { %v4201_v44 = vpop.f32.mrf.mxu0  ;;  %v4203_v47 = vpop.f32.mrf.mxu1  ;;  %v1070_v14 = vmul.f32 0.35355338, %v3676_v51 }
  0xf1   : > { %v3678_v18 = vpop.eup %3677 }
  0xf2   : > { %v3461_v50 = vpop.f32.mrf.mxu0  ;;  %v3467_v8 = vpop.f32.mrf.mxu1  ;;  %v1068_v23 = vmul.f32 0.35355338, %v3678_v18 }
  0xf3   : > { %v4243_v8 = vsel %vm1946_vm2, -100000.0, %v1494_v59 }
  0xf4   : > { %v1380_v56 = vpop.f32.mrf.mxu0  ;;  %v1423_v62 = vpop.f32.mrf.mxu1  ;;  %v2066_v10 = vsel %vm2056_vm1, %v4243_v8, -inf }
  0xf5   : > { %v2023_v56 = vrot.slane %v2006_v38, %v4206_v49  ;;  %v1457_v62 = vrot.slane %v1066_v25, %v4040_v61 }
  0xf6   : > { %v3462_v5 = vpop.f32.mrf.mxu0  ;;  %v3468_v58 = vpop.f32.mrf.mxu1 }
  0xf7   : > { %v1496_v12 = vmul.f32 %v1457_v62, %v4193_v22  ;;  %vm2043_vm11 = vcmp.eq.s32.totalorder %v4078_v36, %v2023_v56  ;;  %v1853_v22 = vrot.slane %v1837_v27, %v4179_v9  ;;  %v1989_v36 = vrot.slane %v1973_v43, %v4179_v9 }
  0xf8   : > { %v1536_v26 = vpop.f32.mrf.mxu0  ;;  %v1576_v37 = vpop.f32.mrf.mxu1  ;;  %v1461_v27 = vrot.slane %v1068_v23, %v4040_v61 }
  0xf9   : > { %v1912_v32 = vmul.f32 %v1875_v15, %v1536_v26  ;;  %v1913_v16 = vmul.f32 %v1879_v17, %v1576_v37  ;;  %v1867_v37 = vrot.slane %v1839_v3, %v4179_v9  ;;  %v4286_v38 = vsel %vm1948_vm12, -100000.0, %v1496_v12 }
  0xfa   : > { %v3473_v1 = vpop.f32.mrf.mxu0  ;;  %v3479_v35 = vpop.f32.mrf.mxu1  ;;  %v2027_v13 = vrot.slane %v1989_v36, %v4206_v49  ;;  %v2072_v52 = vsel %vm2056_vm1, %v4286_v38, -inf  ;;  %v1869_v3 = vcombine.high %v1853_v22, %v1853_v22  ;;  %vm1466_vm12 = vcmask 1041409  }
  0xfb   : > { %v4227_v39 = vsel %vm2040_vm14, -100000.0, %v1912_v32  ;;  %v4229_v40 = vsel %vm2041_vm15, -100000.0, %v1913_v16  ;;  %v2003_v32 = vrot.slane %v1975_v11, %v4179_v9  ;;  %v4275_v16 = vpop.permute.xlu1 %1921  ;;  %v1465_v1 = vrot.slane %v1070_v14, %v4040_v61 }
  0xfc   : > { %v1539_v7 = vpop.f32.mrf.mxu0  ;;  %v1579_v42 = vpop.f32.mrf.mxu1  ;;  %v2081_v50 = vsel %vm2056_vm1, %v4227_v39, -inf  ;;  %v2084_v31 = vsel %vm2056_vm1, %v4229_v40, -inf  ;;  %v4281_v35 = vsel %vm1947_vm10, -100000.0, %v1495_v4  ;;  %v1926_v34 = vrot.slane %v4275_v16, %v4040_v61 }
  0xfd   : > { %2082 = vmax.xlane.f32.xlu0 %v2081_v50  ;;  %2085 = vmax.xlane.f32.xlu1 %v2084_v31  ;;  %v2031_v43 = vrot.slane %v2003_v32, %v4206_v49  ;;  %v1891_v7 = vrot.slane %v1853_v22, %v4206_v49  ;;  %v1895_v42 = vrot.slane %v1867_v37, %v4206_v49  ;;  %v2069_v51 = vsel %vm2056_vm1, %v4281_v35, -inf }
  0xfe   : > { %v3474_v53 = vpop.f32.mrf.mxu0  ;;  %v3480_v54 = vpop.f32.mrf.mxu1  ;;  %v1497_v50 = vmul.f32 %v1461_v27, %v4201_v44  ;;  %vm2044_vm13 = vcmp.eq.s32.totalorder %v4082_v45, %v2027_v13  ;;  %v2005_v44 = vcombine.high %v1989_v36, %v1989_v36  ;;  %v2007_v62 = vcombine.high %v2003_v32, %v2003_v32 }
  0xff   : > { %v1498_v53 = vmul.f32 %v1465_v1, %v4203_v47  ;;  %vm2045_vm9 = vcmp.eq.s32.totalorder %v4100_v60, %v2031_v43  ;;  %v1871_v4 = vcombine.high %v1867_v37, %v1867_v37  ;;  %vm1949_vm14 = vcmp.eq.s32.totalorder %v4140_v28, %v4171_v57 }
 0x100   : > { %v1616_v5 = vpop.f32.mrf.mxu0  ;;  %v1656_v58 = vpop.f32.mrf.mxu1  ;;  %vm1950_vm15 = vcmp.eq.s32.totalorder %v4275_v16, %v1926_v34  ;;  %v4314_v45 = vsel %vm1949_vm14, -100000.0, %v1497_v50  ;;  %v2035_v12 = vrot.slane %v2005_v44, %v4206_v49  ;;  %v2039_v14 = vrot.slane %v2007_v62, %v4206_v49 }
 0x101   : > { %v1914_v15 = vmul.f32 %v1883_v2, %v1616_v5  ;;  %v1915_v17 = vmul.f32 %v1887_v63, %v1656_v58  ;;  %2064 = vmax.xlane.f32.xlu0 %v2063_v6  ;;  %2067 = vmax.xlane.f32.xlu1 %v2066_v10  ;;  %v4316_v60 = vsel %vm1950_vm15, -100000.0, %v1498_v53 }
 0x102   : > { %v3485_v24 = vpop.f32.mrf.mxu0  ;;  %v3491_v25 = vpop.f32.mrf.mxu1  ;;  %vm2046_vm2 = vcmp.eq.s32.totalorder %v4140_v28, %v2035_v12  ;;  %vm2047_vm10 = vcmp.eq.s32.totalorder %v4275_v16, %v2039_v14 }
 0x103   : > { %v4263_v21 = vsel %vm2042_vm0, -100000.0, %v1914_v15  ;;  %v4265_v26 = vsel %vm2043_vm11, -100000.0, %v1915_v17  ;;  %v1899_v15 = vrot.slane %v1869_v3, %v4206_v49  ;;  %v1903_v17 = vrot.slane %v1871_v4, %v4206_v49 }
 0x104   : > { %v1619_v29 = vpop.f32.mrf.mxu0  ;;  %v1659_v30 = vpop.f32.mrf.mxu1  ;;  %v2087_v59 = vsel %vm2056_vm1, %v4263_v21, -inf  ;;  %v2090_v33 = vsel %vm2056_vm1, %v4265_v26, -inf  ;;  %v2075_v24 = vsel %vm2056_vm1, %v4314_v45, -inf  ;;  %v2078_v25 = vsel %vm2056_vm1, %v4316_v60, -inf }
 0x105   : > { %2088 = vmax.xlane.f32.xlu0 %v2087_v59  ;;  %2091 = vmax.xlane.f32.xlu1 %v2090_v33  ;;  %vm2293_vm0 = vcmask 1041408   ;;  %vm4667_vm11 = vmmov 0  }
 0x106   : > { %v3486_v41 = vpop.f32.mrf.mxu0  ;;  %v3492_v9 = vpop.f32.mrf.mxu1 }
 0x108   : > { %v1696_v48 = vpop.f32.mrf.mxu0  ;;  %v1736_v31 = vpop.f32.mrf.mxu1 }
 0x109   : > { %v1916_v54 = vmul.f32 %v1891_v7, %v1696_v48  ;;  %v1917_v55 = vmul.f32 %v1895_v42, %v1736_v31  ;;  %2070 = vmax.xlane.f32.xlu0 %v2069_v51  ;;  %2073 = vmax.xlane.f32.xlu1 %v2072_v52 }
 0x10a   : > { %v3497_v56 = vpop.f32.mrf.mxu0  ;;  %v3503_v18 = vpop.f32.mrf.mxu1 }
 0x10b   : > { %v4303_v2 = vsel %vm2044_vm13, -100000.0, %v1916_v54  ;;  %v4305_v63 = vsel %vm2045_vm9, -100000.0, %v1917_v55 }
 0x10c   : > { %v1699_v5 = vpop.f32.mrf.mxu0  ;;  %v1739_v47 = vpop.f32.mrf.mxu1  ;;  %v2093_v58 = vsel %vm2056_vm1, %v4303_v2, -inf  ;;  %v2096_v6 = vsel %vm2056_vm1, %v4305_v63, -inf }
 0x10d   : > { %2094 = vmax.xlane.f32.xlu0 %v2093_v58  ;;  %2097 = vmax.xlane.f32.xlu1 %v2096_v6 }
 0x10e   : > { %v3498_v10 = vpop.f32.mrf.mxu0  ;;  %v3504_v11 = vpop.f32.mrf.mxu1 }
 0x110   : > { %v1776_v23 = vpop.f32.mrf.mxu0  ;;  %v1816_v57 = vpop.f32.mrf.mxu1 }
 0x111   : > { %v1918_v22 = vmul.f32 %v1899_v15, %v1776_v23  ;;  %v1919_v37 = vmul.f32 %v1903_v17, %v1816_v57  ;;  %2076 = vmax.xlane.f32.xlu0 %v2075_v24  ;;  %2079 = vmax.xlane.f32.xlu1 %v2078_v25 }
 0x112   : > { %v3509_v29 = vpop.f32.mrf.mxu0  ;;  %v3515_v30 = vpop.f32.mrf.mxu1 }
 0x113   : > { %v4328_v59 = vsel %vm2046_vm2, -100000.0, %v1918_v22  ;;  %v4330_v49 = vsel %vm2047_vm10, -100000.0, %v1919_v37 }
 0x114   : > { %v1779_v33 = vpop.f32.mrf.mxu0  ;;  %v1819_v36 = vpop.f32.mrf.mxu1  ;;  %v2099_v32 = vsel %vm2056_vm1, %v4328_v59, -inf  ;;  %v2102_v1 = vsel %vm2056_vm1, %v4330_v49, -inf }
 0x115   : > { %2100 = vmax.xlane.f32.xlu0 %v2099_v32  ;;  %2103 = vmax.xlane.f32.xlu1 %v2102_v1 }
 0x116   : > { %v3510_v27 = vpop.f32.mrf.mxu0  ;;  %v3516_v41 = vpop.f32.mrf.mxu1 }
 0x166   : > { %v2059_v9 = vpop.xlane.xlu1 %2058  ;;  %v2062_v28 = vpop.xlane.xlu0 %2061 }
 0x186   : > { %v2083_v13 = vpop.xlane.xlu0 %2082  ;;  %v2086_v16 = vpop.xlane.xlu1 %2085 }
 0x187   : > { %v4336_v43 = vmax.f32 %v2059_v9, %v2083_v13  ;;  %v4338_v7 = vmax.f32 %v2062_v28, %v2086_v16 }
 0x189   : > { %v2113_v42 = vsub.f32 %v4126_v19, %v4336_v43  ;;  %v2137_v34 = vsub.f32 %v4227_v39, %v4336_v43  ;;  %v2114_v50 = vsub.f32 %v4128_v20, %v4338_v7  ;;  %v2138_v48 = vsub.f32 %v4229_v40, %v4338_v7 }
 0x18a   : > { %v2065_v31 = vpop.xlane.xlu0 %2064  ;;  %v2068_v51 = vpop.xlane.xlu1 %2067 }
 0x18b   : > { %v2121_v52 = vmul.f32 1.442695, %v2113_v42  ;;  %v2145_v53 = vmul.f32 1.442695, %v2137_v34  ;;  %v2123_v54 = vmul.f32 1.442695, %v2114_v50 }
 0x18c   : > { %v2147_v55 = vmul.f32 1.442695, %v2138_v48 }
 0x18d   : > { %3679 = vpow2.f32 %v2121_v52 }
 0x18e   : > { %3681 = vpow2.f32 %v2145_v53  ;;  %v2089_v56 = vpop.xlane.xlu0 %2088  ;;  %v2092_v18 = vpop.xlane.xlu1 %2091 }
 0x18f   : > { %3683 = vpow2.f32 %v2123_v54  ;;  %v4348_v19 = vmax.f32 %v2065_v31, %v2089_v56  ;;  %v4350_v39 = vmax.f32 %v2068_v51, %v2092_v18 }
 0x190   : > { %3685 = vpow2.f32 %v2147_v55 }
 0x191   : > { %v2115_v20 = vsub.f32 %v4241_v46, %v4348_v19  ;;  %v2139_v40 = vsub.f32 %v4263_v21, %v4348_v19  ;;  %v2116_v44 = vsub.f32 %v4243_v8, %v4350_v39  ;;  %v2140_v62 = vsub.f32 %v4265_v26, %v4350_v39 }
 0x192   : > { %v2071_v3 = vpop.xlane.xlu0 %2070  ;;  %v2074_v4 = vpop.xlane.xlu1 %2073 }
 0x193   : > { %v2125_v5 = vmul.f32 1.442695, %v2115_v20  ;;  %v2149_v47 = vmul.f32 1.442695, %v2139_v40  ;;  %v2127_v58 = vmul.f32 1.442695, %v2116_v44 }
 0x194   : > { %v2151_v6 = vmul.f32 1.442695, %v2140_v62 }
 0x195   : > { %3687 = vpow2.f32 %v2125_v5 }
 0x196   : > { %3689 = vpow2.f32 %v2149_v47  ;;  %v2095_v10 = vpop.xlane.xlu0 %2094  ;;  %v2098_v11 = vpop.xlane.xlu1 %2097 }
 0x197   : > { %3691 = vpow2.f32 %v2127_v58  ;;  %v4360_v46 = vmax.f32 %v2071_v3, %v2095_v10  ;;  %v4362_v21 = vmax.f32 %v2074_v4, %v2098_v11  ;;  %v814_v10 = vld [vmem:[%s718_s23] sm:$0x3] }
 0x198   : > { %3693 = vpow2.f32 %v2151_v6  ;;  %v806_v11 = vld [vmem:[%s695_s8] sm:$0x3] }
 0x199   : > { %v2117_v8 = vsub.f32 %v4281_v35, %v4360_v46  ;;  %v2141_v26 = vsub.f32 %v4303_v2, %v4360_v46  ;;  %v2118_v12 = vsub.f32 %v4286_v38, %v4362_v21  ;;  %v2142_v14 = vsub.f32 %v4305_v63, %v4362_v21 }
 0x19a   : > { %v4372_v15 = vpop.eup %3679  ;;  %v2077_v17 = vpop.xlane.xlu0 %2076 }
 0x19b   : > { %v2080_v23 = vpop.xlane.xlu1 %2079  ;;  %v4374_v57 = vpop.eup %3681  ;;  %v2129_v24 = vmul.f32 1.442695, %v2117_v8  ;;  %v2153_v25 = vmul.f32 1.442695, %v2141_v26  ;;  %v2131_v22 = vmul.f32 1.442695, %v2118_v12 }
 0x19c   : > { %v4376_v37 = vpop.eup %3683  ;;  %v2155_v35 = vmul.f32 1.442695, %v2142_v14  ;;  %v2161_v2 = vsel %vm2056_vm1, %v4372_v15, 0.0  ;;  %v2185_v32 = vsel %vm2056_vm1, %v4374_v57, 0.0  ;;  %v2295_v8 = vsel %vm2293_vm0, %v814_v10, 0 }
 0x19d   : > { %v4380_v29 = vpop.eup %3685  ;;  %3695 = vpow2.f32 %v2129_v24  ;;  %2162 = vadd.xlane.f32.xlu0 %v2161_v2  ;;  %v2164_v38 = vsel %vm2056_vm1, %v4376_v37, 0.0  ;;  %v4459_v26 = vsel %vm2293_vm0, %v806_v11, 0  ;;  %3518 = vmatpush3.bf16.msra.mxu0 %v2295_v8  ;;  %v807_v12 = vld [vmem:[%s695_s8 + $0x2] sm:$0x3]  ;;  %v808_v14 = vld [vmem:[%s695_s8 + $0x4] sm:$0x3] }
 0x19e   : > { %3697 = vpow2.f32 %v2153_v25  ;;  %2165 = vadd.xlane.f32.xlu1 %v2164_v38  ;;  %v2101_v63 = vpop.xlane.xlu0 %2100  ;;  %v2188_v1 = vsel %vm2056_vm1, %v4380_v29, 0.0  ;;  %3524 = vmatpush3.bf16.msra.mxu1 %v4459_v26  ;;  %v809_v24 = vld [vmem:[%s695_s8 + $0x6] sm:$0x3]  ;;  %v810_v25 = vld [vmem:[%s695_s8 + $0x8] sm:$0x3] }
 0x19f   : > { %v2104_v30 = vpop.xlane.xlu1 %2103  ;;  %3699 = vpow2.f32 %v2131_v22  ;;  %v4384_v33 = vmax.f32 %v2077_v17, %v2101_v63  ;;  %3529 = vmatprep.subr.bf16.mxu0 %v3767_v0  ;;  %3535 = vmatprep.subr.bf16.mxu1 %v3767_v0  ;;  %v4465_v17 = vsel %vm2293_vm0, %v807_v12, 0  ;;  %v4471_v22 = vsel %vm2293_vm0, %v809_v24, 0  ;;  %v811_v2 = vld [vmem:[%s695_s8 + $0xa] sm:$0x3]  ;;  %v812_v38 = vld [vmem:[%s695_s8 + $0xc] sm:$0x3] }
 0x1a0   : > { %v4386_v36 = vmax.f32 %v2080_v23, %v2104_v30  ;;  %3701 = vpow2.f32 %v2155_v35  ;;  %v4468_v23 = vsel %vm2293_vm0, %v808_v14, 0  ;;  %v4474_v35 = vsel %vm2293_vm0, %v810_v25, 0 }
 0x1a1   : > { %v2119_v27 = vsub.f32 %v4314_v45, %v4384_v33  ;;  %v2143_v41 = vsub.f32 %v4328_v59, %v4384_v33  ;;  %2186 = vadd.xlane.f32.xlu0 %v2185_v32  ;;  %v4477_v63 = vsel %vm2293_vm0, %v811_v2, 0  ;;  %v4480_v30 = vsel %vm2293_vm0, %v812_v38, 0  ;;  %v813_v32 = vld [vmem:[%s695_s8 + $0xe] sm:$0x3] }
 0x1a2   : > { %v2120_v9 = vsub.f32 %v4316_v60, %v4386_v36  ;;  %v2144_v28 = vsub.f32 %v4330_v49, %v4386_v36  ;;  %v4400_v13 = vpop.eup %3687  ;;  %2189 = vadd.xlane.f32.xlu1 %v2188_v1  ;;  %v4483_v1 = vsel %vm2293_vm0, %v813_v32, 0 }
 0x1a3   : > { %v4402_v16 = vpop.eup %3689  ;;  %v2133_v42 = vmul.f32 1.442695, %v2119_v27  ;;  %v2157_v45 = vmul.f32 1.442695, %v2143_v41  ;;  %v2167_v59 = vsel %vm2056_vm1, %v4400_v13, 0.0 }
 0x1a4   : > { %v2135_v34 = vmul.f32 1.442695, %v2120_v9  ;;  %v4404_v50 = vpop.eup %3691  ;;  %v2159_v60 = vmul.f32 1.442695, %v2144_v28  ;;  %v2191_v31 = vsel %vm2056_vm1, %v4402_v16, 0.0 }
 0x1a5   : > { %v4408_v48 = vpop.eup %3693  ;;  %3703 = vpow2.f32 %v2133_v42  ;;  %2168 = vadd.xlane.f32.xlu0 %v2167_v59  ;;  %v2170_v49 = vsel %vm2056_vm1, %v4404_v50, 0.0 }
 0x1a6   : > { %2171 = vadd.xlane.f32.xlu1 %v2170_v49  ;;  %3705 = vpow2.f32 %v2135_v34  ;;  %v2194_v51 = vsel %vm2056_vm1, %v4408_v48, 0.0 }
 0x1a7   : > { %3707 = vpow2.f32 %v2157_v45 }
 0x1a8   : > { %3709 = vpow2.f32 %v2159_v60 }
 0x1a9   : > { %2192 = vadd.xlane.f32.xlu0 %v2191_v31 }
 0x1aa   : > { %v4416_v52 = vpop.eup %3695  ;;  %2195 = vadd.xlane.f32.xlu1 %v2194_v51 }
 0x1ab   : > { %v4418_v53 = vpop.eup %3697  ;;  %v2173_v54 = vsel %vm2056_vm1, %v4416_v52, 0.0 }
 0x1ac   : > { %v4422_v55 = vpop.eup %3699  ;;  %v2197_v20 = vsel %vm2056_vm1, %v4418_v53, 0.0 }
 0x1ad   : > { %v4424_v56 = vpop.eup %3701  ;;  %2174 = vadd.xlane.f32.xlu0 %v2173_v54  ;;  %v2176_v18 = vsel %vm2056_vm1, %v4422_v55, 0.0 }
 0x1ae   : > { %2177 = vadd.xlane.f32.xlu1 %v2176_v18  ;;  %v2200_v40 = vsel %vm2056_vm1, %v4424_v56, 0.0 }
 0x1b1   : > { %2198 = vadd.xlane.f32.xlu0 %v2197_v20 }
 0x1b2   : > { %v4432_v44 = vpop.eup %3703  ;;  %2201 = vadd.xlane.f32.xlu1 %v2200_v40 }
 0x1b3   : > { %v2179_v62 = vsel %vm2056_vm1, %v4432_v44, 0.0  ;;  %v4436_v3 = vpop.eup %3705 }
 0x1b4   : > { %v4438_v4 = vpop.eup %3707  ;;  %v2182_v5 = vsel %vm2056_vm1, %v4436_v3, 0.0 }
 0x1b5   : > { %2180 = vadd.xlane.f32.xlu0 %v2179_v62  ;;  %v4442_v47 = vpop.eup %3709  ;;  %v2203_v58 = vsel %vm2056_vm1, %v4438_v4, 0.0 }
 0x1b6   : > { %2183 = vadd.xlane.f32.xlu1 %v2182_v5  ;;  %v2206_v6 = vsel %vm2056_vm1, %v4442_v47, 0.0  ;;  %vm2289_vm1 = vcmask 31744  }
 0x1b9   : > { %2204 = vadd.xlane.f32.xlu0 %v2203_v58 }
 0x1ba   : > { %2207 = vadd.xlane.f32.xlu1 %v2206_v6 }
 0x226   : > { %v2163_v27 = vpop.xlane.xlu0 %2162 }
 0x227   : > { %v2166_v41 = vpop.xlane.xlu1 %2165 }
 0x22a   : > { %v2187_v9 = vpop.xlane.xlu0 %2186 }
 0x22b   : > { %v2209_v28 = vadd.f32 %v2187_v9, %v2163_v27  ;;  %v2190_v42 = vpop.xlane.xlu1 %2189 }
 0x22c   : > { %v2210_v34 = vadd.f32 %v2190_v42, %v2166_v41 }
 0x22d   : > { %3711 = vrcp.f32 %v2209_v28 }
 0x22e   : > { %v2169_v45 = vpop.xlane.xlu0 %2168  ;;  %3713 = vrcp.f32 %v2210_v34 }
 0x22f   : > { %v2172_v59 = vpop.xlane.xlu1 %2171  ;;  %3715 = vlog2.f32 %v2209_v28 }
 0x230   : > { %3717 = vlog2.f32 %v2210_v34 }
 0x232   : > { %v2193_v60 = vpop.xlane.xlu0 %2192 }
 0x233   : > { %v2211_v49 = vadd.f32 %v2193_v60, %v2169_v45  ;;  %v2196_v31 = vpop.xlane.xlu1 %2195 }
 0x234   : > { %v2212_v51 = vadd.f32 %v2196_v31, %v2172_v59 }
 0x235   : > { %3719 = vlog2.f32 %v2211_v49 }
 0x236   : > { %3721 = vrcp.f32 %v2211_v49  ;;  %v2175_v54 = vpop.xlane.xlu0 %2174 }
 0x237   : > { %3723 = vlog2.f32 %v2212_v51  ;;  %v2178_v18 = vpop.xlane.xlu1 %2177 }
 0x238   : > { %3725 = vrcp.f32 %v2212_v51 }
 0x23a   : > { %v2199_v20 = vpop.xlane.xlu0 %2198  ;;  %v4485_v40 = vpop.eup %3711 }
 0x23b   : > { %v2213_v62 = vadd.f32 %v2199_v20, %v2175_v54  ;;  %v2202_v5 = vpop.xlane.xlu1 %2201  ;;  %v2273_v6 = vmul.f32 %v4485_v40, %v4374_v57  ;;  %v4489_v10 = vpop.eup %3713 }
 0x23c   : > { %v2214_v58 = vadd.f32 %v2202_v5, %v2178_v18  ;;  %v2274_v12 = vmul.f32 %v4489_v10, %v4380_v29  ;;  %v3716_v24 = vpop.eup %3715 }
 0x23d   : > { %3727 = vlog2.f32 %v2213_v62  ;;  %v2281_v8 = vpack.c.bf16 %v2273_v6, %v2273_v6  ;;  %v3718_v2 = vpop.eup %3717  ;;  %v2218_v32 = vmul.f32 0.6931472, %v3716_v24 }
 0x23e   : > { %3729 = vrcp.f32 %v2213_v62  ;;  %v2181_v11 = vpop.xlane.xlu0 %2180  ;;  %v2282_v25 = vpack.c.bf16 %v2274_v12, %v2274_v12  ;;  %v2220_v28 = vmul.f32 0.6931472, %v3718_v2 }
 0x23f   : > { %3731 = vlog2.f32 %v2214_v58  ;;  %v2184_v14 = vpop.xlane.xlu1 %2183  ;;  %3520 = vmatmul.mubr.msk.bf16.vlgmr.msra.gmra.mxu0 %vm2289_vm1, %v2281_v8  ;;  %v2233_v31 = vadd.f32 %v2218_v32, %v4336_v43 }
 0x240   : > { %3733 = vrcp.f32 %v2214_v58  ;;  %3530 = vmatpush3.bf16.msra.mxu0 %v4465_v17  ;;  %3531 = vmatprep.mubr.msk.bf16.mxu0 %vm4667_vm11, %v3767_v0  ;;  %v2234_v51 = vadd.f32 %v2220_v28, %v4338_v7 }
 0x241   : > { %3526 = vmatmul.mubr.msk.bf16.vlgmr.msra.gmra.mxu1 %vm2289_vm1, %v2282_v25  ;;  %3541 = vmatprep.subr.bf16.mxu0 %v3767_v0 }
 0x242   : > { %v3720_v57 = vpop.eup %3719  ;;  %v2205_v38 = vpop.xlane.xlu0 %2204  ;;  %3536 = vmatpush3.bf16.msra.mxu1 %v4468_v23  ;;  %3537 = vmatprep.mubr.msk.bf16.mxu1 %vm4667_vm11, %v3767_v0  ;;  %v3038_v62 = vrot.slane %v2234_v51, %v4040_v61 }
 0x243   : > { %v4499_v29 = vpop.eup %3721  ;;  %v2215_v27 = vadd.f32 %v2205_v38, %v2181_v11  ;;  %v2208_v41 = vpop.xlane.xlu1 %2207  ;;  %3547 = vmatprep.subr.bf16.mxu1 %v3767_v0  ;;  %v2222_v59 = vmul.f32 0.6931472, %v3720_v57 }
 0x244   : > { %v3724_v9 = vpop.eup %3723  ;;  %v2216_v42 = vadd.f32 %v2208_v41, %v2184_v14  ;;  %v2275_v34 = vmul.f32 %v4499_v29, %v4402_v16 }
 0x245   : > { %v4507_v45 = vpop.eup %3725  ;;  %3735 = vlog2.f32 %v2215_v27  ;;  %v2224_v54 = vmul.f32 0.6931472, %v3724_v9  ;;  %v2235_v18 = vadd.f32 %v2222_v59, %v4348_v19  ;;  %v3034_v19 = vrot.slane %v2233_v31, %v4040_v61 }
 0x246   : > { %3737 = vrcp.f32 %v2215_v27  ;;  %v2283_v60 = vpack.c.bf16 %v2275_v34, %v2275_v34  ;;  %v2276_v49 = vmul.f32 %v4507_v45, %v4408_v48 }
 0x247   : > { %3739 = vlog2.f32 %v2216_v42  ;;  %v2236_v5 = vadd.f32 %v2224_v54, %v4350_v39  ;;  %v3042_v11 = vrot.slane %v2235_v18, %v4040_v61  ;;  %v3063_v25 = vsel %vm1466_vm12, %v3038_v62, %v3034_v19 }
 0x248   : > { %3741 = vrcp.f32 %v2216_v42  ;;  %3532 = vmatmul.mubr.msk.bf16.vlgmr.msra.gmra.mxu0 %vm2289_vm1, %v2283_v60  ;;  %v2284_v16 = vpack.c.bf16 %v2276_v49, %v2276_v49 }
 0x249   : > { %3542 = vmatpush3.bf16.msra.mxu0 %v4471_v22  ;;  %3543 = vmatprep.mubr.msk.bf16.mxu0 %vm4667_vm11, %v3767_v0  ;;  %v3046_v39 = vrot.slane %v2236_v5, %v4040_v61  ;;  %v3064_v57 = vsel %vm882_vm3, %v3042_v11, %v3063_v25  ;;  %vm3014_vm3 = vcmask 58368  }
 0x24a   : > { %v3728_v20 = vpop.eup %3727  ;;  %3538 = vmatmul.mubr.msk.bf16.vlgmr.msra.gmra.mxu1 %vm2289_vm1, %v2284_v16  ;;  %3553 = vmatprep.subr.bf16.mxu0 %v3767_v0 }
 0x24b   : > { %v4520_v43 = vpop.eup %3729  ;;  %v2226_v7 = vmul.f32 0.6931472, %v3728_v20  ;;  %3548 = vmatpush3.bf16.msra.mxu1 %v4474_v35  ;;  %3549 = vmatprep.mubr.msk.bf16.mxu1 %vm4667_vm11, %v3767_v0  ;;  %v3065_v27 = vsel %vm884_vm4, %v3046_v39, %v3064_v57 }
 0x24c   : > { %v3732_v48 = vpop.eup %3731  ;;  %v2277_v58 = vmul.f32 %v4520_v43, %v4418_v53  ;;  %3559 = vmatprep.subr.bf16.mxu1 %v3767_v0 }
 0x24d   : > { %v4531_v6 = vpop.eup %3733  ;;  %v2237_v8 = vadd.f32 %v2226_v7, %v4360_v46  ;;  %v2228_v12 = vmul.f32 0.6931472, %v3732_v48 }
 0x24e   : > { %v2285_v14 = vpack.c.bf16 %v2277_v58, %v2277_v58  ;;  %v2278_v24 = vmul.f32 %v4531_v6, %v4424_v56 }
 0x24f   : > { %v2238_v2 = vadd.f32 %v2228_v12, %v4362_v21  ;;  %v3050_v38 = vrot.slane %v2237_v8, %v4040_v61 }
 0x250   : > { %3544 = vmatmul.mubr.msk.bf16.vlgmr.msra.gmra.mxu0 %vm2289_vm1, %v2285_v14  ;;  %v2286_v53 = vpack.c.bf16 %v2278_v24, %v2278_v24 }
 0x251   : > { %3554 = vmatpush3.bf16.msra.mxu0 %v4477_v63  ;;  %3555 = vmatprep.mubr.msk.bf16.mxu0 %vm4667_vm11, %v3767_v0  ;;  %v3054_v41 = vrot.slane %v2238_v2, %v4040_v61  ;;  %v3066_v42 = vsel %vm886_vm5, %v3050_v38, %v3065_v27 }
 0x252   : > { %v3736_v46 = vpop.eup %3735  ;;  %3550 = vmatmul.mubr.msk.bf16.vlgmr.msra.gmra.mxu1 %vm2289_vm1, %v2286_v53  ;;  %3565 = vmatprep.subr.bf16.mxu0 %v3767_v0 }
 0x253   : > { %v4547_v56 = vpop.eup %3737  ;;  %v2230_v21 = vmul.f32 0.6931472, %v3736_v46  ;;  %3560 = vmatpush3.bf16.msra.mxu1 %v4480_v30  ;;  %3561 = vmatprep.mubr.msk.bf16.mxu1 %vm4667_vm11, %v3767_v0  ;;  %v3067_v54 = vsel %vm888_vm6, %v3054_v41, %v3066_v42 }
 0x254   : > { %v3740_v32 = vpop.eup %3739  ;;  %v2279_v9 = vmul.f32 %v4547_v56, %v4438_v4  ;;  %3571 = vmatprep.subr.bf16.mxu1 %v3767_v0 }
 0x255   : > { %v3742_v28 = vpop.eup %3741  ;;  %v2239_v34 = vadd.f32 %v2230_v21, %v4384_v33  ;;  %v2232_v59 = vmul.f32 0.6931472, %v3740_v32 }
 0x256   : > { %v2287_v60 = vpack.c.bf16 %v2279_v9, %v2279_v9  ;;  %v2280_v49 = vmul.f32 %v3742_v28, %v4442_v47 }
 0x257   : > { %v3058_v31 = vrot.slane %v2239_v34, %v4040_v61  ;;  %v2240_v51 = vadd.f32 %v2232_v59, %v4386_v36  ;;  %v2257_v36 = vmul.f32 %v4485_v40, %v4372_v15 }
 0x258   : > { %3556 = vmatmul.mubr.msk.bf16.vlgmr.msra.gmra.mxu0 %vm2289_vm1, %v2287_v60  ;;  %v2288_v4 = vpack.c.bf16 %v2280_v49, %v2280_v49 }
 0x259   : > { %v3068_v16 = vsel %vm890_vm7, %v3058_v31, %v3067_v54  ;;  %v3062_v33 = vrot.slane %v2240_v51, %v4040_v61  ;;  %3566 = vmatpush3.bf16.msra.mxu0 %v4459_v26  ;;  %3567 = vmatprep.mubr.msk.bf16.mxu0 %vm4667_vm11, %v3767_v0  ;;  %v2258_v61 = vmul.f32 %v4489_v10, %v4376_v37 }
 0x25a   : > { %3562 = vmatmul.mubr.msk.bf16.vlgmr.msra.gmra.mxu1 %vm2289_vm1, %v2288_v4  ;;  %3577 = vmatprep.subr.bf16.mxu0 %v3767_v0  ;;  %v2265_v26 = vpack.c.bf16 %v2257_v36, %v2257_v36  ;;  %v2260_v37 = vmul.f32 %v4507_v45, %v4404_v50  ;;  %v2262_v50 = vmul.f32 %v4531_v6, %v4422_v55 }
 0x25b   : > { %v3069_v47 = vsel %vm892_vm8, %v3062_v33, %v3068_v16  ;;  %3572 = vmatpush3.bf16.msra.mxu1 %v4465_v17  ;;  %3573 = vmatprep.mubr.msk.bf16.mxu1 %vm4667_vm11, %v3767_v0  ;;  %v2266_v15 = vpack.c.bf16 %v2258_v61, %v2258_v61  ;;  %v2259_v17 = vmul.f32 %v4499_v29, %v4400_v13 }
 0x25c   : > { %3071 = vst.msk [vmem:[%s795_s12] sm:$0xff] %vm2289_vm1, %v3069_v47  ;;  %3583 = vmatprep.subr.bf16.mxu1 %v3767_v0  ;;  %v2268_v40 = vpack.c.bf16 %v2260_v37, %v2260_v37  ;;  %v2261_v13 = vmul.f32 %v4520_v43, %v4416_v52  ;;  %v2263_v52 = vmul.f32 %v4547_v56, %v4432_v44 }
 0x25d   : > { %v2264_v55 = vmul.f32 %v3742_v28, %v4436_v3 }
 0x25f   : > { %v2272_v10 = vpack.c.bf16 %v2264_v55, %v2264_v55 }
 0x260   : > { %3568 = vmatmul.mubr.msk.bf16.vlgmr.msra.gmra.mxu0 %vm2289_vm1, %v2265_v26 }
 0x261   : > { %3578 = vmatpush3.bf16.msra.mxu0 %v4468_v23  ;;  %3579 = vmatprep.mubr.msk.bf16.mxu0 %vm4667_vm11, %v3767_v0  ;;  %v2267_v23 = vpack.c.bf16 %v2259_v17, %v2259_v17 }
 0x262   : > { %3574 = vmatmul.mubr.msk.bf16.vlgmr.msra.gmra.mxu1 %vm2289_vm1, %v2266_v15  ;;  %3589 = vmatprep.subr.bf16.mxu0 %v3767_v0 }
 0x263   : > { %3584 = vmatpush3.bf16.msra.mxu1 %v4471_v22  ;;  %3585 = vmatprep.mubr.msk.bf16.mxu1 %vm4667_vm11, %v3767_v0  ;;  %v2269_v22 = vpack.c.bf16 %v2261_v13, %v2261_v13 }
 0x264   : > { %3595 = vmatprep.subr.bf16.mxu1 %v3767_v0 }
 0x268   : > { %3580 = vmatmul.mubr.msk.bf16.vlgmr.msra.gmra.mxu0 %vm2289_vm1, %v2267_v23 }
 0x269   : > { %3590 = vmatpush3.bf16.msra.mxu0 %v4474_v35  ;;  %3591 = vmatprep.mubr.msk.bf16.mxu0 %vm4667_vm11, %v3767_v0  ;;  %v2270_v35 = vpack.c.bf16 %v2262_v50, %v2262_v50 }
 0x26a   : > { %3586 = vmatmul.mubr.msk.bf16.vlgmr.msra.gmra.mxu1 %vm2289_vm1, %v2268_v40  ;;  %3601 = vmatprep.subr.bf16.mxu0 %v3767_v0 }
 0x26b   : > { %3596 = vmatpush3.bf16.msra.mxu1 %v4477_v63  ;;  %3597 = vmatprep.mubr.msk.bf16.mxu1 %vm4667_vm11, %v3767_v0  ;;  %v2271_v63 = vpack.c.bf16 %v2263_v52, %v2263_v52 }
 0x26c   : > { %3607 = vmatprep.subr.bf16.mxu1 %v3767_v0 }
 0x270   : > { %3592 = vmatmul.mubr.msk.bf16.vlgmr.msra.gmra.mxu0 %vm2289_vm1, %v2269_v22 }
 0x271   : > { %3602 = vmatpush3.bf16.msra.mxu0 %v4480_v30  ;;  %3603 = vmatprep.mubr.msk.bf16.mxu0 %vm4667_vm11, %v3767_v0 }
 0x272   : > { %3598 = vmatmul.mubr.msk.bf16.vlgmr.msra.gmra.mxu1 %vm2289_vm1, %v2270_v35 }
 0x273   : > { %3608 = vmatpush3.bf16.msra.mxu1 %v4483_v1  ;;  %3609 = vmatprep.mubr.msk.bf16.mxu1 %vm4667_vm11, %v3767_v0 }
 0x278   : > { %3604 = vmatmul.mubr.msk.bf16.vlgmr.msra.gmra.mxu0 %vm2289_vm1, %v2271_v63 }
 0x27a   : > { %3610 = vmatmul.mubr.msk.bf16.vlgmr.msra.gmra.mxu1 %vm2289_vm1, %v2272_v10 }
 0x2ff   : > { %v2331_v30 = vpop.f32.mrf.mxu0 }
 0x301   : > { %v2377_v29 = vpop.f32.mrf.mxu1  ;;  %v3521_v45 = vpop.f32.mrf.mxu0 }
 0x303   : > { %v3527_v18 = vpop.f32.mrf.mxu1  ;;  %v2334_v20 = vpop.f32.mrf.mxu0 }
 0x305   : > { %v2380_v43 = vpop.f32.mrf.mxu1  ;;  %v3522_v44 = vpop.f32.mrf.mxu0 }
 0x307   : > { %v3528_v7 = vpop.f32.mrf.mxu1 }
 0x308   : > { %v2423_v1 = vpop.f32.mrf.mxu0 }
 0x30a   : > { %v2469_v48 = vpop.f32.mrf.mxu1  ;;  %v3533_v19 = vpop.f32.mrf.mxu0 }
 0x30c   : > { %v3539_v0 = vpop.f32.mrf.mxu1  ;;  %v2426_v62 = vpop.f32.mrf.mxu0 }
 0x30e   : > { %v2472_v3 = vpop.f32.mrf.mxu1  ;;  %v3534_v5 = vpop.f32.mrf.mxu0 }
 0x310   : > { %v3540_v58 = vpop.f32.mrf.mxu1  ;;  %v2515_v6 = vpop.f32.mrf.mxu0 }
 0x312   : > { %v2561_v11 = vpop.f32.mrf.mxu1  ;;  %v3545_v8 = vpop.f32.mrf.mxu0 }
 0x314   : > { %v3551_v12 = vpop.f32.mrf.mxu1  ;;  %v2518_v14 = vpop.f32.mrf.mxu0 }
 0x316   : > { %v2564_v24 = vpop.f32.mrf.mxu1  ;;  %v3546_v25 = vpop.f32.mrf.mxu0 }
 0x318   : > { %v3552_v39 = vpop.f32.mrf.mxu1  ;;  %v2607_v2 = vpop.f32.mrf.mxu0 }
 0x31a   : > { %v2653_v53 = vpop.f32.mrf.mxu1  ;;  %v3557_v57 = vpop.f32.mrf.mxu0 }
 0x31c   : > { %v3563_v38 = vpop.f32.mrf.mxu1  ;;  %v2610_v46 = vpop.f32.mrf.mxu0 }
 0x31e   : > { %v2656_v56 = vpop.f32.mrf.mxu1  ;;  %v3558_v21 = vpop.f32.mrf.mxu0 }
 0x320   : > { %v3564_v32 = vpop.f32.mrf.mxu1  ;;  %v2696_v27 = vpop.f32.mrf.mxu0 }
 0x321   : > { %v2697_v41 = vadd.f32 %v2696_v27, %v2331_v30 }
 0x322   : > { %v2739_v9 = vpop.f32.mrf.mxu1  ;;  %v3569_v28 = vpop.f32.mrf.mxu0 }
 0x323   : > { %v3006_v42 = vpack.c.bf16 %v2697_v41, %v2697_v41  ;;  %v2740_v34 = vadd.f32 %v2739_v9, %v2377_v29 }
 0x324   : > { %v3575_v59 = vpop.f32.mrf.mxu1  ;;  %v2699_v60 = vpop.f32.mrf.mxu0 }
 0x325   : > { %3015 = vst.msk [vmem:[%s4630_s14] sm:$0x3] %vm3014_vm3, %v3006_v42  ;;  %v3007_v49 = vpack.c.bf16 %v2740_v34, %v2740_v34 }
 0x326   : > { %v2742_v31 = vpop.f32.mrf.mxu1  ;;  %v3570_v51 = vpop.f32.mrf.mxu0 }
 0x327   : > { %3016 = vst.msk [vmem:[%s4630_s14 + $0x2] sm:$0x3] %vm3014_vm3, %v3007_v49 }
 0x328   : > { %v3576_v54 = vpop.f32.mrf.mxu1  ;;  %v2782_v4 = vpop.f32.mrf.mxu0 }
 0x329   : > { %v2783_v16 = vadd.f32 %v2782_v4, %v2423_v1 }
 0x32a   : > { %v2825_v33 = vpop.f32.mrf.mxu1  ;;  %v3581_v36 = vpop.f32.mrf.mxu0 }
 0x32b   : > { %v3008_v47 = vpack.c.bf16 %v2783_v16, %v2783_v16  ;;  %v2826_v61 = vadd.f32 %v2825_v33, %v2469_v48 }
 0x32c   : > { %v3587_v26 = vpop.f32.mrf.mxu1  ;;  %v2785_v15 = vpop.f32.mrf.mxu0 }
 0x32d   : > { %3017 = vst.msk [vmem:[%s4630_s14 + $0x4] sm:$0x3] %vm3014_vm3, %v3008_v47  ;;  %v3009_v17 = vpack.c.bf16 %v2826_v61, %v2826_v61 }
 0x32e   : > { %v2828_v37 = vpop.f32.mrf.mxu1  ;;  %v3582_v23 = vpop.f32.mrf.mxu0 }
 0x32f   : > { %3018 = vst.msk [vmem:[%s4630_s14 + $0x6] sm:$0x3] %vm3014_vm3, %v3009_v17 }
 0x330   : > { %v3588_v40 = vpop.f32.mrf.mxu1  ;;  %v2868_v13 = vpop.f32.mrf.mxu0 }
 0x331   : > { %v2869_v50 = vadd.f32 %v2868_v13, %v2515_v6 }
 0x332   : > { %v2911_v22 = vpop.f32.mrf.mxu1  ;;  %v3593_v35 = vpop.f32.mrf.mxu0 }
 0x333   : > { %v3010_v52 = vpack.c.bf16 %v2869_v50, %v2869_v50  ;;  %v2912_v55 = vadd.f32 %v2911_v22, %v2561_v11 }
 0x334   : > { %v3599_v63 = vpop.f32.mrf.mxu1  ;;  %v2871_v10 = vpop.f32.mrf.mxu0 }
 0x335   : > { %3019 = vst.msk [vmem:[%s4630_s14 + $0x8] sm:$0x3] %vm3014_vm3, %v3010_v52  ;;  %v3011_v30 = vpack.c.bf16 %v2912_v55, %v2912_v55 }
 0x336   : > { %v2914_v29 = vpop.f32.mrf.mxu1  ;;  %v3594_v45 = vpop.f32.mrf.mxu0 }
 0x337   : > { %3020 = vst.msk [vmem:[%s4630_s14 + $0xa] sm:$0x3] %vm3014_vm3, %v3011_v30 }
 0x338   : > { %v3600_v18 = vpop.f32.mrf.mxu1  ;;  %v2954_v20 = vpop.f32.mrf.mxu0 }
 0x339   : > { %v2955_v43 = vadd.f32 %v2954_v20, %v2607_v2 }
 0x33a   : > { %v3000_v44 = vpop.f32.mrf.mxu1  ;;  %v3605_v7 = vpop.f32.mrf.mxu0 }
 0x33b   : > { %v3012_v1 = vpack.c.bf16 %v2955_v43, %v2955_v43  ;;  %v3001_v48 = vadd.f32 %v3000_v44, %v2653_v53 }
 0x33c   : > { %v3611_v19 = vpop.f32.mrf.mxu1  ;;  %v2957_v0 = vpop.f32.mrf.mxu0 }
 0x33d   : > { %3021 = vst.msk [vmem:[%s4630_s14 + $0xc] sm:$0x3] %vm3014_vm3, %v3012_v1  ;;  %v3013_v62 = vpack.c.bf16 %v3001_v48, %v3001_v48 }
 0x33e   : > { %v3003_v3 = vpop.f32.mrf.mxu1  ;;  %v3606_v5 = vpop.f32.mrf.mxu0 }
 0x33f   : > { %3022 = vst.msk [vmem:[%s4630_s14 + $0xe] sm:$0x3] %vm3014_vm3, %v3013_v62 }
 0x340   : > { %v3612_v58 = vpop.f32.mrf.mxu1 }
 0x341 PF: > { %s18_s26 = sadd.s32 1, %s3765_s26   ;;  %s4668_s24 = smov %s3761_s25 }
 0x342   : > { %p15_p5 = scmp.ge.s32.totalorder %s18_s26, 10   ;;  %s4669_s25 = smov %s4671_s27 }
 0x344   :  { %17 = sbr.rel (!%p15_p5) target bundleno = 2 (0x2), region = 101 }

// kernel: reformer_forward.20
= control target key start
LH: loop header
LB: loop body
LE: loop exit
PB: predicated region body
PF: predicated region fallthrough
CT: control target
= control target key end

     0   :  { %vm52_vm0 = vcmask 261120   ;;  %s192_s1 = inlined_call_operand.vmem [shape: bf16[32,32], index: 1, kind: input, shape index: {}]   ;;  %s193_s0 = inlined_call_operand.vmem [shape: bf16[32,32], index: 0, kind: input, shape index: {}]   ;;  %s194_s2 = inlined_call_operand.vmem [shape: f32[1,32], index: 2, kind: input, shape index: {}]   ;;  %s195_s3 = inlined_call_operand.vmem [shape: f32[32,32], index: 3, kind: output, shape index: {}]  }
   0x1   :  { %v135_v0 = vld [vmem:[%s192_s1 + $0x8] sm:$0xff]   ;;  %v136_v1 = vld [vmem:[%s192_s1] sm:$0xff]  }
   0x2   :  { %127 = vmatprep.subr.bf16.mxu0 %v135_v0  ;;  %v137_v2 = vld [vmem:[%s193_s0] sm:$0xff]   ;;  %v138_v3 = vld [vmem:[%s193_s0 + $0x8] sm:$0xff]  }
   0x3   :  { %128 = vmatpush3.bf16.msra.mxu0 %v135_v0  ;;  %131 = vmatprep.mubr.msk.bf16.mxu0 %vm52_vm0, %v137_v2  ;;  %v116_v4 = vld [vmem:[%s194_s2] ss:$0 sm:$0xff] }
   0x4   :  { %129 = vmatprep.subr.bf16.mxu0 %v136_v1 }
   0x7   :  { %130 = vmatpush3.bf16.msra.mxu0 %v136_v1 }
   0xa   :  { %132 = vmatmul.mubr.msk.bf16.vlgmr.msra.gmra.mxu0 %vm52_vm0, %v138_v3 }
  0xca   :  { %v133_v5 = vpop.f32.mrf.mxu0 }
  0xcb   :  { %v102_v6 = vadd.f32 %v133_v5, %v116_v4 }
  0xcc   :  { %v93_v7 = vpop.f32.mrf.mxu0 }
  0xcd   :  { %110 = vst.msk [vmem:[%s195_s3 + $0x10] sm:$0xff] %vm52_vm0, %v102_v6  ;;  %v94_v8 = vadd.f32 %v116_v4, %v93_v7 }
  0xce   :  { %v134_v9 = vpop.f32.mrf.mxu0 }
  0xcf   :  { %108 = vst.msk [vmem:[%s195_s3] sm:$0xff] %vm52_vm0, %v94_v8  ;;  %v105_v10 = vadd.f32 %v134_v9, %v116_v4 }
  0xd0   :  { %v96_v11 = vpop.f32.mrf.mxu0 }
  0xd1   :  { %111 = vst.msk [vmem:[%s195_s3 + $0x18] sm:$0xff] %vm52_vm0, %v105_v10  ;;  %v97_v12 = vadd.f32 %v116_v4, %v96_v11 }
  0xd3   :  { %109 = vst.msk [vmem:[%s195_s3 + $0x8] sm:$0xff] %vm52_vm0, %v97_v12 }

// kernel: reformer_forward.22
= control target key start
LH: loop header
LB: loop body
LE: loop exit
PB: predicated region body
PF: predicated region fallthrough
CT: control target
= control target key end

     0   :  { %vm52_vm0 = vcmask 261120   ;;  %s243_s1 = inlined_call_operand.vmem [shape: bf16[32,128], index: 1, kind: input, shape index: {}]   ;;  %s244_s0 = inlined_call_operand.vmem [shape: bf16[32,32], index: 0, kind: input, shape index: {}]   ;;  %s245_s2 = inlined_call_operand.vmem [shape: f32[1,128], index: 2, kind: input, shape index: {}]   ;;  %s246_s3 = inlined_call_operand.vmem [shape: bf16[32,128], index: 3, kind: output, shape index: {}]  }
   0x1   :  { %v190_v0 = vld [vmem:[%s243_s1 + $0x8] sm:$0xff]   ;;  %v191_v1 = vld [vmem:[%s243_s1] sm:$0xff]  }
   0x2   :  { %182 = vmatprep.subr.bf16.mxu0 %v190_v0  ;;  %v192_v2 = vld [vmem:[%s244_s0] sm:$0xff]   ;;  %v193_v3 = vld [vmem:[%s244_s0 + $0x8] sm:$0xff]  }
   0x3   :  { %183 = vmatpush3.bf16.msra.mxu0 %v190_v0  ;;  %186 = vmatprep.mubr.msk.bf16.mxu0 %vm52_vm0, %v192_v2  ;;  %v152_v4 = vld [vmem:[%s245_s2] ss:$0 sm:$0xff] }
   0x4   :  { %184 = vmatprep.subr.bf16.mxu0 %v191_v1 }
   0x7   :  { %185 = vmatpush3.bf16.msra.mxu0 %v191_v1 }
   0xa   :  { %187 = vmatmul.mubr.msk.bf16.vlgmr.msra.gmra.mxu0 %vm52_vm0, %v193_v3 }
  0xca   :  { %v188_v5 = vpop.f32.mrf.mxu0 }
  0xcb   :  { %v102_v6 = vadd.f32 %v188_v5, %v152_v4 }
  0xcc   :  { %v93_v7 = vpop.f32.mrf.mxu0 }
  0xcd   :  { %v114_v8 = vmul.f32 0.70710677, %v102_v6  ;;  %v94_v9 = vadd.f32 %v152_v4, %v93_v7  ;;  %v110_v21 = vmul.f32 0.5, %v102_v6 }
  0xce   :  { %v189_v10 = vpop.f32.mrf.mxu0 }
  0xcf   :  { %194 = verf.f32 %v114_v8  ;;  %v112_v11 = vmul.f32 0.70710677, %v94_v9  ;;  %v105_v12 = vadd.f32 %v189_v10, %v152_v4  ;;  %v108_v26 = vmul.f32 0.5, %v94_v9 }
  0xd0   :  { %v96_v13 = vpop.f32.mrf.mxu0 }
  0xd1   :  { %196 = verf.f32 %v112_v11  ;;  %v115_v14 = vmul.f32 0.70710677, %v105_v12  ;;  %v97_v15 = vadd.f32 %v152_v4, %v96_v13  ;;  %v111_v23 = vmul.f32 0.5, %v105_v12 }
  0xd3   :  { %198 = verf.f32 %v115_v14  ;;  %v113_v16 = vmul.f32 0.70710677, %v97_v15  ;;  %v109_v29 = vmul.f32 0.5, %v97_v15 }
  0xd5   :  { %200 = verf.f32 %v113_v16 }
  0xdc   :  { %v195_v17 = vpop.eup %194 }
  0xdd   :  { %v122_v19 = vadd.f32 1.0, %v195_v17 }
  0xde   :  { %v197_v18 = vpop.eup %196 }
  0xdf   :  { %v120_v22 = vadd.f32 1.0, %v197_v18  ;;  %v126_v27 = vmul.f32 %v122_v19, %v110_v21 }
  0xe0   :  { %v199_v20 = vpop.eup %198 }
  0xe1   :  { %v123_v24 = vadd.f32 1.0, %v199_v20  ;;  %v124_v31 = vmul.f32 %v120_v22, %v108_v26 }
  0xe2   :  { %v201_v25 = vpop.eup %200 }
  0xe3   :  { %v127_v28 = vmul.f32 %v123_v24, %v111_v23  ;;  %v121_v30 = vadd.f32 1.0, %v201_v25 }
  0xe5   :  { %v175_v32 = vpack.c.bf16 %v127_v28, %v126_v27  ;;  %v125_v33 = vmul.f32 %v121_v30, %v109_v29 }
  0xe7   :  { %177 = vst [vmem:[%s246_s3 + $0x8] sm:$0xff] %v175_v32   ;;  %v170_v34 = vpack.c.bf16 %v125_v33, %v124_v31 }
  0xe9   :  { %171 = vst [vmem:[%s246_s3] sm:$0xff] %v170_v34  }

// kernel: reformer_forward.23
= control target key start
LH: loop header
LB: loop body
LE: loop exit
PB: predicated region body
PF: predicated region fallthrough
CT: control target
= control target key end

     0   :  { %vm151_vm0 = vcmask 261120   ;;  %s276_s1 = inlined_call_operand.vmem [shape: bf16[128,32], index: 1, kind: input, shape index: {}]   ;;  %s277_s0 = inlined_call_operand.vmem [shape: bf16[32,128], index: 0, kind: input, shape index: {}]   ;;  %s278_s2 = inlined_call_operand.vmem [shape: f32[1,32], index: 2, kind: input, shape index: {}]   ;;  %s279_s3 = inlined_call_operand.vmem [shape: f32[32,32], index: 3, kind: output, shape index: {}]  }
   0x1   :  { %v201_v0 = vld [vmem:[%s276_s1 + $0x38] sm:$0xff]   ;;  %v202_v1 = vld [vmem:[%s276_s1 + $0x30] sm:$0xff]   ;;  %v203_v2 = vld [vmem:[%s276_s1 + $0x28] sm:$0xff]  }
   0x2   :  { %181 = vmatprep.subr.bf16.mxu0 %v201_v0  ;;  %v204_v3 = vld [vmem:[%s276_s1 + $0x20] sm:$0xff]   ;;  %v205_v5 = vld [vmem:[%s276_s1 + $0x18] sm:$0xff]   ;;  %v206_v6 = vld [vmem:[%s276_s1 + $0x10] sm:$0xff]  }
   0x3   :  { %182 = vmatpush3.bf16.msra.mxu0 %v201_v0  ;;  %v209_v4 = vld [vmem:[%s277_s0] sm:$0xff]   ;;  %v207_v7 = vld [vmem:[%s276_s1 + $0x8] sm:$0xff]  }
   0x4   :  { %183 = vmatprep.subr.bf16.mxu0 %v202_v1  ;;  %197 = vmatprep.mubr.bf16.mxu0 %v209_v4  ;;  %v208_v8 = vld [vmem:[%s276_s1] sm:$0xff]   ;;  %v210_v9 = vld [vmem:[%s277_s0 + $0x8] sm:$0xff]  }
   0x5   :  { %v160_v10 = vld [vmem:[%s278_s2] ss:$0 sm:$0xff] }
   0x7   :  { %184 = vmatpush3.bf16.msra.mxu0 %v202_v1 }
   0x8   :  { %185 = vmatprep.subr.bf16.mxu0 %v203_v2 }
   0xb   :  { %186 = vmatpush3.bf16.msra.mxu0 %v203_v2 }
   0xc   :  { %187 = vmatprep.subr.bf16.mxu0 %v204_v3 }
   0xf   :  { %188 = vmatpush3.bf16.msra.mxu0 %v204_v3 }
  0x10   :  { %189 = vmatprep.subr.bf16.mxu0 %v205_v5 }
  0x13   :  { %190 = vmatpush3.bf16.msra.mxu0 %v205_v5 }
  0x14   :  { %191 = vmatprep.subr.bf16.mxu0 %v206_v6 }
  0x17   :  { %192 = vmatpush3.bf16.msra.mxu0 %v206_v6 }
  0x18   :  { %193 = vmatprep.subr.bf16.mxu0 %v207_v7 }
  0x1b   :  { %194 = vmatpush3.bf16.msra.mxu0 %v207_v7 }
  0x1c   :  { %195 = vmatprep.subr.bf16.mxu0 %v208_v8 }
  0x1f   :  { %196 = vmatpush3.bf16.msra.mxu0 %v208_v8 }
  0x22   :  { %198 = vmatmul.mubr.bf16.vlgmr.msra.gmra.mxu0 %v210_v9 }
  0xe2   :  { %v199_v11 = vpop.f32.mrf.mxu0 }
  0xe3   :  { %v145_v12 = vadd.f32 %v199_v11, %v160_v10 }
  0xe4   :  { %v136_v13 = vpop.f32.mrf.mxu0 }
  0xe5   :  { %154 = vst.msk [vmem:[%s279_s3 + $0x10] sm:$0xff] %vm151_vm0, %v145_v12  ;;  %v137_v14 = vadd.f32 %v160_v10, %v136_v13 }
  0xe6   :  { %v200_v15 = vpop.f32.mrf.mxu0 }
  0xe7   :  { %152 = vst.msk [vmem:[%s279_s3] sm:$0xff] %vm151_vm0, %v137_v14  ;;  %v148_v16 = vadd.f32 %v200_v15, %v160_v10 }
  0xe8   :  { %v139_v17 = vpop.f32.mrf.mxu0 }
  0xe9   :  { %155 = vst.msk [vmem:[%s279_s3 + $0x18] sm:$0xff] %vm151_vm0, %v148_v16  ;;  %v140_v18 = vadd.f32 %v160_v10, %v139_v17 }
  0xeb   :  { %153 = vst.msk [vmem:[%s279_s3 + $0x8] sm:$0xff] %vm151_vm0, %v140_v18 }

</bundles_post_ra>
